<compile_context>
chip_gen: v7x
topology: tpu7x:2x2x1
jax: 0.10.0
libtpu: 0.0.40
codegen_flags: <defaults>
</compile_context>

<pallas_src>
import functools

import jax
import jax.numpy as jnp
from jax.experimental import pallas as pl
from jax.experimental.pallas import tpu as pltpu

_SLOPE = 0.2        # PyG GATv2Conv negative_slope default
_NEG_INF = -1e30    # additive mask fill (self-loops guarantee >=1 valid source)


def gatv2_edge_gnn_kernel(
    x_ref, adj1_ref, adj2_ref,
    # conv1 params + precomputed tables
    w1_ref, b1_ref, bias1_ref, ue1_ref, ecol1_ref, attv1_ref, attr1_ref,
    e1_ref, g1_ref, tilen_ref, bdm1_ref,
    # conv2 params + precomputed tables
    w2_ref, b2_ref, bias2_ref, u2_ref, a2row_ref,
    a2relu_ref,                       # SMEM: (1, out_channels) scalar table
    out_ref,
    *, heads, hidden, out_channels):
    f32 = jnp.float32
    n = x_ref.shape[0]
    H, C1, C2 = heads, hidden, out_channels
    hn = H * n

    x = x_ref[...]                                                    # (N, Fin)

    # ---------------- conv1: H heads, concat=True ----------------
    # Fused [W_l | W_r] projection (single f32 MXU matmul).
    proj = jnp.dot(x, w1_ref[...], preferred_element_type=f32) + b1_ref[...]
    xl = proj[:, :H * C1]          # source-side projections   (N, H*C1)
    xr = proj[:, H * C1:]          # target-side projections   (N, H*C1)

    # Lane-packed source operand: xl_packed[c, h*N + j] = xl[j, h, c].
    # One 2-D transpose + per-head row slices, once per layer (outside loops).
    xl_t = xl.T                                                       # (H*C1, N)
    xl_packed = jnp.concatenate(
        [xl_t[h * C1:(h + 1) * C1, :] for h in range(H)], axis=1)     # (C1, H*N)

    # Per-channel target slabs via ONE expansion matmul (MXU):
    # xr_exp[i, c*H*N + h*N + j] = xr[i, h, c].
    xr_exp = jnp.dot(xr, ecol1_ref[...], preferred_element_type=f32)  # (N, C1*H*N)

    # Rank-1 (linear) part of leaky-relu, pulled out of the channel loop:
    #   u_slab[i, h*N+j] = slope * sum_c att[h,c] * xr[i,h,c]   (MXU matmul)
    #   v_row[h*N+j]     = slope * sum_c att[h,c] * xl[j,h,c]   (tiny row ops)
    u_slab = jnp.dot(xr, ue1_ref[...], preferred_element_type=f32)    # (N, H*N)
    v_row = jnp.zeros((1, hn), f32)
    for c in range(C1):
        v_row = v_row + attv1_ref[c:c + 1, :] * xl_packed[c:c + 1, :]

    # Logits slab with the additive adjacency bias folded in up front.
    logits = u_slab + v_row + adj1_ref[...]                           # (N, H*N)

    # ReLU part: per channel add + max + fma on full-width (N, H*N) slabs.
    for c in range(C1):
        s = xr_exp[:, c * hn:(c + 1) * hn] + xl_packed[c:c + 1, :]
        logits = logits + attr1_ref[c:c + 1, :] * jnp.maximum(s, 0.0)

    # Segmented (per-head) softmax over source nodes j.
    m_small = jnp.concatenate(
        [jnp.max(logits[:, h * n:(h + 1) * n], axis=1, keepdims=True)
         for h in range(H)], axis=1)                                  # (N, H)
    m_slab = jnp.dot(m_small, e1_ref[...], preferred_element_type=f32)
    p = jnp.exp(logits - m_slab)            # masked lanes underflow to 0
    denom = jnp.dot(p, g1_ref[...], preferred_element_type=f32)       # group sums
    alpha = p / denom

    # Aggregation: one full-width MXU matmul against block-diagonal xl.
    xl_bd = jnp.dot(tilen_ref[...], xl, preferred_element_type=f32) * bdm1_ref[...]
    h1 = jnp.dot(alpha, xl_bd, preferred_element_type=f32) + bias1_ref[...]  # (N, H*C1)

    # ELU(alpha=1), fused.
    h1 = jnp.where(h1 > 0, h1, jnp.exp(h1) - 1.0)
    # TODO(synk): nn.Dropout / attention dropout are training-time stochastic; identity here.

    # ---------------- conv2: 1 head, concat=False ----------------
    proj2 = jnp.dot(h1, w2_ref[...], preferred_element_type=f32) + b2_ref[...]  # (N, 2*C2)
    xl2 = proj2[:, :C2]
    xr2 = proj2[:, C2:]
    xl2_t = xl2.T                                                     # (C2, N)

    # Rank-1 part via MXU matmuls + additive adjacency bias.
    logits2 = (jnp.dot(xr2, u2_ref[...], preferred_element_type=f32)
               + jnp.dot(a2row_ref[...], xl2_t, preferred_element_type=f32)
               + adj2_ref[...])                                       # (N, N)
    for c in range(C2):
        s = xr2[:, c:c + 1] + xl2_t[c:c + 1, :]
        logits2 = logits2 + a2relu_ref[0, c] * jnp.maximum(s, 0.0)

    m2 = jnp.max(logits2, axis=1, keepdims=True)
    p2 = jnp.exp(logits2 - m2)
    alpha2 = p2 / jnp.sum(p2, axis=1, keepdims=True)

    out = jnp.dot(alpha2, xl2, preferred_element_type=f32) + bias2_ref[...]
    out_ref[...] = out.astype(out_ref.dtype)


def edge_index_to_adj(edge_index, num_nodes):
    """adj[i, j] = 1 iff message edge j -> i (src=edge_index[0], dst=edge_index[1]),
    plus self-loops (PyG add_self_loops=True)."""
    src, dst = edge_index[0], edge_index[1]
    adj = jnp.zeros((num_nodes, num_nodes), jnp.float32).at[dst, src].set(1.0)
    return jnp.maximum(adj, jnp.eye(num_nodes, dtype=jnp.float32))


def _build_conv1_tables(att1, heads, hidden, n, slope=_SLOPE):
    """Wrapper-side constants for the lane-packed / block-diag conv1 path."""
    H, C = heads, hidden
    f32 = jnp.float32
    eye_h = jnp.eye(H, dtype=f32)
    att1 = att1.astype(f32)

    # E: (H, H*N)   head -> slab expansion, E[h, h*N+j] = 1
    e1 = jnp.repeat(eye_h, n, axis=1)
    # att lane tables (C, H*N): [c, h*N+j] = att[h, c]
    att_lane = jnp.repeat(att1.T, n, axis=1)
    attv1 = slope * att_lane
    attr1 = (1.0 - slope) * att_lane
    # UE: (H*C, H*N), UE[h*C+c, h'*N+j] = slope*att[h,c]*(h==h')
    a1s = slope * att1.reshape(H * C, 1) * jnp.repeat(eye_h, C, axis=0)
    ue1 = a1s @ e1
    # Ecol: (H*C, C*H*N), 1 at [h*C+c, c*H*N + h*N + j]
    r = jnp.arange(H * C)
    col = jnp.arange(C * H * n)
    h_col = (col % (H * n)) // n
    c_col = col // (H * n)
    ecol1 = (((r[:, None] // C) == h_col[None, :]) &
             ((r[:, None] % C) == c_col[None, :])).astype(f32)
    # G: (H*N, H*N) block-diag ones (segmented softmax sums via one MXU matmul)
    g1 = jnp.kron(eye_h, jnp.ones((n, n), f32))
    # tilen: (H*N, N) vertical tiling of identity (xl row-tiling on the MXU)
    tilen = jnp.tile(jnp.eye(n, dtype=f32), (H, 1))
    # block-diag mask: (H*N, H*C)
    bdm1 = jnp.kron(eye_h, jnp.ones((n, C), f32))
    return e1, attv1, attr1, ue1, ecol1, g1, tilen, bdm1


def gatv2_edge_gnn(edge_repr, edge_index, params):
    n = edge_repr.shape[0]
    heads, hidden, out_ch = params["heads"], params["hidden"], params["out"]
    f32 = jnp.float32

    # Additive adjacency bias {0, -1e30}, head-tiled for the lane-packed slab.
    adj01 = edge_index_to_adj(edge_index, n)
    adj_bias = jnp.where(adj01 > 0, 0.0, _NEG_INF).astype(f32)   # (N, N)
    adj1 = jnp.tile(adj_bias, (1, heads))                         # (N, H*N)
    adj2 = adj_bias

    # conv1 lane-packing tables.
    e1, attv1, attr1, ue1, ecol1, g1, tilen, bdm1 = _build_conv1_tables(
        params["conv1"]["att"], heads, hidden, n)

    # conv2 (single head) tables.
    att2 = params["conv2"]["att"].reshape(-1).astype(f32)         # (out_ch,)
    u2 = jnp.broadcast_to((_SLOPE * att2)[:, None], (out_ch, n)).astype(f32)
    a2row = (_SLOPE * att2).reshape(1, out_ch)
    a2relu = ((1.0 - _SLOPE) * att2).reshape(1, out_ch)

    kernel = functools.partial(gatv2_edge_gnn_kernel, heads=heads,
                               hidden=hidden, out_channels=out_ch)
    vmem = pl.BlockSpec(memory_space=pltpu.MemorySpace.VMEM)
    smem = pl.BlockSpec(memory_space=pltpu.MemorySpace.SMEM)

    return pl.pallas_call(
        kernel,
        out_shape=jax.ShapeDtypeStruct((n, out_ch), f32),
        in_specs=[vmem] * 19 + [smem],
        out_specs=vmem,
        compiler_params=pltpu.CompilerParams(vmem_limit_bytes=32 * 1024 * 1024),
    )(edge_repr.astype(f32), adj1, adj2,
      params["conv1"]["w"], params["conv1"]["b"], params["conv1"]["bias"],
      ue1, ecol1, attv1, attr1, e1, g1, tilen, bdm1,
      params["conv2"]["w"], params["conv2"]["b"], params["conv2"]["bias"],
      u2, a2row,
      a2relu)


def init_gatv2_params(key, in_ch, out_ch, heads, concat):
    kl, kr, ka = jax.random.split(key, 3)

    def glorot(k, shape):
        lim = jnp.sqrt(6.0 / (shape[0] + shape[1]))
        return jax.random.uniform(k, shape, jnp.float32, -lim, lim)

    out_dim = heads * out_ch if concat else out_ch
    return {
        # Fused projection weight [W_l | W_r] -> one MXU matmul per layer.
        "w": jnp.concatenate([glorot(kl, (in_ch, heads * out_ch)),
                              glorot(kr, (in_ch, heads * out_ch))], axis=1),
        "b": jnp.zeros((1, 2 * heads * out_ch), jnp.float32),
        "att": glorot(ka, (heads, out_ch)),
        "bias": jnp.zeros((1, out_dim), jnp.float32),
    }


if __name__ == "__main__":
    in_channels, hidden_channels, out_channels, heads = 16, 8, 4, 8
    num_nodes = 16  # number of "edge representations" fed to the GNN

    key = jax.random.PRNGKey(0)
    kx, k1, k2 = jax.random.split(key, 3)

    # Inputs
    edge_repr = jax.random.normal(kx, (num_nodes, in_channels), jnp.float32)
    # Deterministic ring graph (both directions), no duplicate edges.
    src = jnp.arange(num_nodes, dtype=jnp.int32)
    dst = (src + 1) % num_nodes
    edge_index = jnp.concatenate(
        [jnp.stack([src, dst]), jnp.stack([dst, src])], axis=1)          # (2, 32)

    # Parameters (deterministic init)
    params = {
        "conv1": init_gatv2_params(k1, in_channels, hidden_channels, heads, True),
        "conv2": init_gatv2_params(k2, hidden_channels * heads, out_channels, 1, False),
        "heads": heads, "hidden": hidden_channels, "out": out_channels,
    }

    out = gatv2_edge_gnn(edge_repr, edge_index, params)
    jax.block_until_ready(out)
    assert out.shape == (num_nodes, out_channels)
    print("KERNEL_OK")
</pallas_src>

<mosaic_0001>
module attributes {stable_mosaic.version = 11 : i64} {
  func.func @gatv2_edge_gnn_kernel(%arg0: memref<16x16xf32, #tpu.memory_space<vmem>>, %arg1: memref<16x128xf32, #tpu.memory_space<vmem>>, %arg2: memref<16x16xf32, #tpu.memory_space<vmem>>, %arg3: memref<16x128xf32, #tpu.memory_space<vmem>>, %arg4: memref<1x128xf32, #tpu.memory_space<vmem>>, %arg5: memref<1x64xf32, #tpu.memory_space<vmem>>, %arg6: memref<64x128xf32, #tpu.memory_space<vmem>>, %arg7: memref<64x1024xf32, #tpu.memory_space<vmem>>, %arg8: memref<8x128xf32, #tpu.memory_space<vmem>>, %arg9: memref<8x128xf32, #tpu.memory_space<vmem>>, %arg10: memref<8x128xf32, #tpu.memory_space<vmem>>, %arg11: memref<128x128xf32, #tpu.memory_space<vmem>>, %arg12: memref<128x16xf32, #tpu.memory_space<vmem>>, %arg13: memref<128x64xf32, #tpu.memory_space<vmem>>, %arg14: memref<64x8xf32, #tpu.memory_space<vmem>>, %arg15: memref<1x8xf32, #tpu.memory_space<vmem>>, %arg16: memref<1x4xf32, #tpu.memory_space<vmem>>, %arg17: memref<4x16xf32, #tpu.memory_space<vmem>>, %arg18: memref<1x4xf32, #tpu.memory_space<vmem>>, %arg19: memref<1x4xf32, #tpu.memory_space<smem>>, %arg20: memref<16x4xf32, #tpu.memory_space<vmem>>) attributes {dimension_semantics = [], scalar_prefetch = 0 : i64, scratch_operands = 0 : i64, tpu.core_type = #tpu.core_type<tc>} {
    %c0 = arith.constant 0 : index
    %c0_0 = arith.constant 0 : index
    %0 = vector.load %arg0[%c0, %c0_0] : memref<16x16xf32, #tpu.memory_space<vmem>>, vector<16x16xf32>
    %c0_1 = arith.constant 0 : index
    %c0_2 = arith.constant 0 : index
    %1 = vector.load %arg3[%c0_1, %c0_2] : memref<16x128xf32, #tpu.memory_space<vmem>>, vector<16x128xf32>
    %cst = arith.constant dense<0.000000e+00> : vector<16x128xf32>
    %2 = tpu.matmul %0, %1, %cst {dimension_numbers = #tpu.dot_dimension_numbers<[1], [0], [0], [1], [0, 0, 1, 1], [], []>} : vector<16x16xf32>, vector<16x128xf32>, vector<16x128xf32> -> vector<16x128xf32>
    %c0_3 = arith.constant 0 : index
    %c0_4 = arith.constant 0 : index
    %3 = vector.load %arg4[%c0_3, %c0_4] : memref<1x128xf32, #tpu.memory_space<vmem>>, vector<1x128xf32>
    %4 = vector.broadcast %3 : vector<1x128xf32> to vector<16x128xf32>
    %5 = arith.addf %2, %4 : vector<16x128xf32>
    %6 = vector.extract_strided_slice %5 {offsets = [0, 0], sizes = [16, 64], strides = [1, 1]} : vector<16x128xf32> to vector<16x64xf32>
    %7 = vector.extract_strided_slice %5 {offsets = [0, 64], sizes = [16, 64], strides = [1, 1]} : vector<16x128xf32> to vector<16x64xf32>
    %8 = tpu.transpose %6, [1, 0] : vector<16x64xf32> -> vector<64x16xf32>
    %9 = vector.extract_strided_slice %8 {offsets = [0, 0], sizes = [8, 16], strides = [1, 1]} : vector<64x16xf32> to vector<8x16xf32>
    %10 = vector.extract_strided_slice %8 {offsets = [8, 0], sizes = [8, 16], strides = [1, 1]} : vector<64x16xf32> to vector<8x16xf32>
    %11 = vector.extract_strided_slice %8 {offsets = [16, 0], sizes = [8, 16], strides = [1, 1]} : vector<64x16xf32> to vector<8x16xf32>
    %12 = vector.extract_strided_slice %8 {offsets = [24, 0], sizes = [8, 16], strides = [1, 1]} : vector<64x16xf32> to vector<8x16xf32>
    %13 = vector.extract_strided_slice %8 {offsets = [32, 0], sizes = [8, 16], strides = [1, 1]} : vector<64x16xf32> to vector<8x16xf32>
    %14 = vector.extract_strided_slice %8 {offsets = [40, 0], sizes = [8, 16], strides = [1, 1]} : vector<64x16xf32> to vector<8x16xf32>
    %15 = vector.extract_strided_slice %8 {offsets = [48, 0], sizes = [8, 16], strides = [1, 1]} : vector<64x16xf32> to vector<8x16xf32>
    %16 = vector.extract_strided_slice %8 {offsets = [56, 0], sizes = [8, 16], strides = [1, 1]} : vector<64x16xf32> to vector<8x16xf32>
    %17 = tpu.concatenate %9, %10, %11, %12, %13, %14, %15, %16 in 1 : vector<8x16xf32>, vector<8x16xf32>, vector<8x16xf32>, vector<8x16xf32>, vector<8x16xf32>, vector<8x16xf32>, vector<8x16xf32>, vector<8x16xf32> -> vector<8x128xf32>
    %c0_5 = arith.constant 0 : index
    %c0_6 = arith.constant 0 : index
    %18 = vector.load %arg7[%c0_5, %c0_6] : memref<64x1024xf32, #tpu.memory_space<vmem>>, vector<64x1024xf32>
    %cst_7 = arith.constant dense<0.000000e+00> : vector<16x1024xf32>
    %19 = tpu.matmul %7, %18, %cst_7 {dimension_numbers = #tpu.dot_dimension_numbers<[1], [0], [0], [1], [0, 0, 1, 1], [], []>} : vector<16x64xf32>, vector<64x1024xf32>, vector<16x1024xf32> -> vector<16x1024xf32>
    %c0_8 = arith.constant 0 : index
    %c0_9 = arith.constant 0 : index
    %20 = vector.load %arg6[%c0_8, %c0_9] : memref<64x128xf32, #tpu.memory_space<vmem>>, vector<64x128xf32>
    %cst_10 = arith.constant dense<0.000000e+00> : vector<16x128xf32>
    %21 = tpu.matmul %7, %20, %cst_10 {dimension_numbers = #tpu.dot_dimension_numbers<[1], [0], [0], [1], [0, 0, 1, 1], [], []>} : vector<16x64xf32>, vector<64x128xf32>, vector<16x128xf32> -> vector<16x128xf32>
    %cst_11 = arith.constant 0.000000e+00 : f32
    %22 = vector.broadcast %cst_11 : f32 to vector<1x128xf32>
    %c0_12 = arith.constant 0 : index
    %c0_13 = arith.constant 0 : index
    %23 = vector.load %arg8[%c0_12, %c0_13] : memref<8x128xf32, #tpu.memory_space<vmem>>, vector<1x128xf32>
    %24 = vector.extract_strided_slice %17 {offsets = [0, 0], sizes = [1, 128], strides = [1, 1]} : vector<8x128xf32> to vector<1x128xf32>
    %25 = arith.mulf %23, %24 : vector<1x128xf32>
    %26 = arith.addf %22, %25 : vector<1x128xf32>
    %c1 = arith.constant 1 : index
    %c0_14 = arith.constant 0 : index
    %27 = vector.load %arg8[%c1, %c0_14] : memref<8x128xf32, #tpu.memory_space<vmem>>, vector<1x128xf32>
    %28 = vector.extract_strided_slice %17 {offsets = [1, 0], sizes = [1, 128], strides = [1, 1]} : vector<8x128xf32> to vector<1x128xf32>
    %29 = arith.mulf %27, %28 : vector<1x128xf32>
    %30 = arith.addf %26, %29 : vector<1x128xf32>
    %c2 = arith.constant 2 : index
    %c0_15 = arith.constant 0 : index
    %31 = vector.load %arg8[%c2, %c0_15] : memref<8x128xf32, #tpu.memory_space<vmem>>, vector<1x128xf32>
    %32 = vector.extract_strided_slice %17 {offsets = [2, 0], sizes = [1, 128], strides = [1, 1]} : vector<8x128xf32> to vector<1x128xf32>
    %33 = arith.mulf %31, %32 : vector<1x128xf32>
    %34 = arith.addf %30, %33 : vector<1x128xf32>
    %c3 = arith.constant 3 : index
    %c0_16 = arith.constant 0 : index
    %35 = vector.load %arg8[%c3, %c0_16] : memref<8x128xf32, #tpu.memory_space<vmem>>, vector<1x128xf32>
    %36 = vector.extract_strided_slice %17 {offsets = [3, 0], sizes = [1, 128], strides = [1, 1]} : vector<8x128xf32> to vector<1x128xf32>
    %37 = arith.mulf %35, %36 : vector<1x128xf32>
    %38 = arith.addf %34, %37 : vector<1x128xf32>
    %c4 = arith.constant 4 : index
    %c0_17 = arith.constant 0 : index
    %39 = vector.load %arg8[%c4, %c0_17] : memref<8x128xf32, #tpu.memory_space<vmem>>, vector<1x128xf32>
    %40 = vector.extract_strided_slice %17 {offsets = [4, 0], sizes = [1, 128], strides = [1, 1]} : vector<8x128xf32> to vector<1x128xf32>
    %41 = arith.mulf %39, %40 : vector<1x128xf32>
    %42 = arith.addf %38, %41 : vector<1x128xf32>
    %c5 = arith.constant 5 : index
    %c0_18 = arith.constant 0 : index
    %43 = vector.load %arg8[%c5, %c0_18] : memref<8x128xf32, #tpu.memory_space<vmem>>, vector<1x128xf32>
    %44 = vector.extract_strided_slice %17 {offsets = [5, 0], sizes = [1, 128], strides = [1, 1]} : vector<8x128xf32> to vector<1x128xf32>
    %45 = arith.mulf %43, %44 : vector<1x128xf32>
    %46 = arith.addf %42, %45 : vector<1x128xf32>
    %c6 = arith.constant 6 : index
    %c0_19 = arith.constant 0 : index
    %47 = vector.load %arg8[%c6, %c0_19] : memref<8x128xf32, #tpu.memory_space<vmem>>, vector<1x128xf32>
    %48 = vector.extract_strided_slice %17 {offsets = [6, 0], sizes = [1, 128], strides = [1, 1]} : vector<8x128xf32> to vector<1x128xf32>
    %49 = arith.mulf %47, %48 : vector<1x128xf32>
    %50 = arith.addf %46, %49 : vector<1x128xf32>
    %c7 = arith.constant 7 : index
    %c0_20 = arith.constant 0 : index
    %51 = vector.load %arg8[%c7, %c0_20] : memref<8x128xf32, #tpu.memory_space<vmem>>, vector<1x128xf32>
    %52 = vector.extract_strided_slice %17 {offsets = [7, 0], sizes = [1, 128], strides = [1, 1]} : vector<8x128xf32> to vector<1x128xf32>
    %53 = arith.mulf %51, %52 : vector<1x128xf32>
    %54 = arith.addf %50, %53 : vector<1x128xf32>
    %55 = vector.broadcast %54 : vector<1x128xf32> to vector<16x128xf32>
    %56 = arith.addf %21, %55 : vector<16x128xf32>
    %c0_21 = arith.constant 0 : index
    %c0_22 = arith.constant 0 : index
    %57 = vector.load %arg1[%c0_21, %c0_22] : memref<16x128xf32, #tpu.memory_space<vmem>>, vector<16x128xf32>
    %58 = arith.addf %56, %57 : vector<16x128xf32>
    %59 = vector.extract_strided_slice %19 {offsets = [0, 0], sizes = [16, 128], strides = [1, 1]} : vector<16x1024xf32> to vector<16x128xf32>
    %60 = vector.extract_strided_slice %17 {offsets = [0, 0], sizes = [1, 128], strides = [1, 1]} : vector<8x128xf32> to vector<1x128xf32>
    %61 = vector.broadcast %60 : vector<1x128xf32> to vector<16x128xf32>
    %62 = arith.addf %59, %61 : vector<16x128xf32>
    %c0_23 = arith.constant 0 : index
    %c0_24 = arith.constant 0 : index
    %63 = vector.load %arg9[%c0_23, %c0_24] : memref<8x128xf32, #tpu.memory_space<vmem>>, vector<1x128xf32>
    %cst_25 = arith.constant 0.000000e+00 : f32
    %64 = vector.broadcast %cst_25 : f32 to vector<16x128xf32>
    %65 = arith.maximumf %62, %64 : vector<16x128xf32>
    %66 = vector.broadcast %63 : vector<1x128xf32> to vector<16x128xf32>
    %67 = arith.mulf %66, %65 : vector<16x128xf32>
    %68 = arith.addf %58, %67 : vector<16x128xf32>
    %69 = vector.extract_strided_slice %19 {offsets = [0, 128], sizes = [16, 128], strides = [1, 1]} : vector<16x1024xf32> to vector<16x128xf32>
    %70 = vector.extract_strided_slice %17 {offsets = [1, 0], sizes = [1, 128], strides = [1, 1]} : vector<8x128xf32> to vector<1x128xf32>
    %71 = vector.broadcast %70 : vector<1x128xf32> to vector<16x128xf32>
    %72 = arith.addf %69, %71 : vector<16x128xf32>
    %c1_26 = arith.constant 1 : index
    %c0_27 = arith.constant 0 : index
    %73 = vector.load %arg9[%c1_26, %c0_27] : memref<8x128xf32, #tpu.memory_space<vmem>>, vector<1x128xf32>
    %cst_28 = arith.constant 0.000000e+00 : f32
    %74 = vector.broadcast %cst_28 : f32 to vector<16x128xf32>
    %75 = arith.maximumf %72, %74 : vector<16x128xf32>
    %76 = vector.broadcast %73 : vector<1x128xf32> to vector<16x128xf32>
    %77 = arith.mulf %76, %75 : vector<16x128xf32>
    %78 = arith.addf %68, %77 : vector<16x128xf32>
    %79 = vector.extract_strided_slice %19 {offsets = [0, 256], sizes = [16, 128], strides = [1, 1]} : vector<16x1024xf32> to vector<16x128xf32>
    %80 = vector.extract_strided_slice %17 {offsets = [2, 0], sizes = [1, 128], strides = [1, 1]} : vector<8x128xf32> to vector<1x128xf32>
    %81 = vector.broadcast %80 : vector<1x128xf32> to vector<16x128xf32>
    %82 = arith.addf %79, %81 : vector<16x128xf32>
    %c2_29 = arith.constant 2 : index
    %c0_30 = arith.constant 0 : index
    %83 = vector.load %arg9[%c2_29, %c0_30] : memref<8x128xf32, #tpu.memory_space<vmem>>, vector<1x128xf32>
    %cst_31 = arith.constant 0.000000e+00 : f32
    %84 = vector.broadcast %cst_31 : f32 to vector<16x128xf32>
    %85 = arith.maximumf %82, %84 : vector<16x128xf32>
    %86 = vector.broadcast %83 : vector<1x128xf32> to vector<16x128xf32>
    %87 = arith.mulf %86, %85 : vector<16x128xf32>
    %88 = arith.addf %78, %87 : vector<16x128xf32>
    %89 = vector.extract_strided_slice %19 {offsets = [0, 384], sizes = [16, 128], strides = [1, 1]} : vector<16x1024xf32> to vector<16x128xf32>
    %90 = vector.extract_strided_slice %17 {offsets = [3, 0], sizes = [1, 128], strides = [1, 1]} : vector<8x128xf32> to vector<1x128xf32>
    %91 = vector.broadcast %90 : vector<1x128xf32> to vector<16x128xf32>
    %92 = arith.addf %89, %91 : vector<16x128xf32>
    %c3_32 = arith.constant 3 : index
    %c0_33 = arith.constant 0 : index
    %93 = vector.load %arg9[%c3_32, %c0_33] : memref<8x128xf32, #tpu.memory_space<vmem>>, vector<1x128xf32>
    %cst_34 = arith.constant 0.000000e+00 : f32
    %94 = vector.broadcast %cst_34 : f32 to vector<16x128xf32>
    %95 = arith.maximumf %92, %94 : vector<16x128xf32>
    %96 = vector.broadcast %93 : vector<1x128xf32> to vector<16x128xf32>
    %97 = arith.mulf %96, %95 : vector<16x128xf32>
    %98 = arith.addf %88, %97 : vector<16x128xf32>
    %99 = vector.extract_strided_slice %19 {offsets = [0, 512], sizes = [16, 128], strides = [1, 1]} : vector<16x1024xf32> to vector<16x128xf32>
    %100 = vector.extract_strided_slice %17 {offsets = [4, 0], sizes = [1, 128], strides = [1, 1]} : vector<8x128xf32> to vector<1x128xf32>
    %101 = vector.broadcast %100 : vector<1x128xf32> to vector<16x128xf32>
    %102 = arith.addf %99, %101 : vector<16x128xf32>
    %c4_35 = arith.constant 4 : index
    %c0_36 = arith.constant 0 : index
    %103 = vector.load %arg9[%c4_35, %c0_36] : memref<8x128xf32, #tpu.memory_space<vmem>>, vector<1x128xf32>
    %cst_37 = arith.constant 0.000000e+00 : f32
    %104 = vector.broadcast %cst_37 : f32 to vector<16x128xf32>
    %105 = arith.maximumf %102, %104 : vector<16x128xf32>
    %106 = vector.broadcast %103 : vector<1x128xf32> to vector<16x128xf32>
    %107 = arith.mulf %106, %105 : vector<16x128xf32>
    %108 = arith.addf %98, %107 : vector<16x128xf32>
    %109 = vector.extract_strided_slice %19 {offsets = [0, 640], sizes = [16, 128], strides = [1, 1]} : vector<16x1024xf32> to vector<16x128xf32>
    %110 = vector.extract_strided_slice %17 {offsets = [5, 0], sizes = [1, 128], strides = [1, 1]} : vector<8x128xf32> to vector<1x128xf32>
    %111 = vector.broadcast %110 : vector<1x128xf32> to vector<16x128xf32>
    %112 = arith.addf %109, %111 : vector<16x128xf32>
    %c5_38 = arith.constant 5 : index
    %c0_39 = arith.constant 0 : index
    %113 = vector.load %arg9[%c5_38, %c0_39] : memref<8x128xf32, #tpu.memory_space<vmem>>, vector<1x128xf32>
    %cst_40 = arith.constant 0.000000e+00 : f32
    %114 = vector.broadcast %cst_40 : f32 to vector<16x128xf32>
    %115 = arith.maximumf %112, %114 : vector<16x128xf32>
    %116 = vector.broadcast %113 : vector<1x128xf32> to vector<16x128xf32>
    %117 = arith.mulf %116, %115 : vector<16x128xf32>
    %118 = arith.addf %108, %117 : vector<16x128xf32>
    %119 = vector.extract_strided_slice %19 {offsets = [0, 768], sizes = [16, 128], strides = [1, 1]} : vector<16x1024xf32> to vector<16x128xf32>
    %120 = vector.extract_strided_slice %17 {offsets = [6, 0], sizes = [1, 128], strides = [1, 1]} : vector<8x128xf32> to vector<1x128xf32>
    %121 = vector.broadcast %120 : vector<1x128xf32> to vector<16x128xf32>
    %122 = arith.addf %119, %121 : vector<16x128xf32>
    %c6_41 = arith.constant 6 : index
    %c0_42 = arith.constant 0 : index
    %123 = vector.load %arg9[%c6_41, %c0_42] : memref<8x128xf32, #tpu.memory_space<vmem>>, vector<1x128xf32>
    %cst_43 = arith.constant 0.000000e+00 : f32
    %124 = vector.broadcast %cst_43 : f32 to vector<16x128xf32>
    %125 = arith.maximumf %122, %124 : vector<16x128xf32>
    %126 = vector.broadcast %123 : vector<1x128xf32> to vector<16x128xf32>
    %127 = arith.mulf %126, %125 : vector<16x128xf32>
    %128 = arith.addf %118, %127 : vector<16x128xf32>
    %129 = vector.extract_strided_slice %19 {offsets = [0, 896], sizes = [16, 128], strides = [1, 1]} : vector<16x1024xf32> to vector<16x128xf32>
    %130 = vector.extract_strided_slice %17 {offsets = [7, 0], sizes = [1, 128], strides = [1, 1]} : vector<8x128xf32> to vector<1x128xf32>
    %131 = vector.broadcast %130 : vector<1x128xf32> to vector<16x128xf32>
    %132 = arith.addf %129, %131 : vector<16x128xf32>
    %c7_44 = arith.constant 7 : index
    %c0_45 = arith.constant 0 : index
    %133 = vector.load %arg9[%c7_44, %c0_45] : memref<8x128xf32, #tpu.memory_space<vmem>>, vector<1x128xf32>
    %cst_46 = arith.constant 0.000000e+00 : f32
    %134 = vector.broadcast %cst_46 : f32 to vector<16x128xf32>
    %135 = arith.maximumf %132, %134 : vector<16x128xf32>
    %136 = vector.broadcast %133 : vector<1x128xf32> to vector<16x128xf32>
    %137 = arith.mulf %136, %135 : vector<16x128xf32>
    %138 = arith.addf %128, %137 : vector<16x128xf32>
    %139 = vector.extract_strided_slice %138 {offsets = [0, 0], sizes = [16, 16], strides = [1, 1]} : vector<16x128xf32> to vector<16x16xf32>
    %cst_47 = arith.constant dense<0xFF800000> : vector<16xf32>
    %140 = vector.multi_reduction <maximumf>, %139, %cst_47 [1] : vector<16x16xf32> to vector<16xf32>
    %141 = vector.shape_cast %140 : vector<16xf32> to vector<16x1xf32>
    %142 = vector.extract_strided_slice %138 {offsets = [0, 16], sizes = [16, 16], strides = [1, 1]} : vector<16x128xf32> to vector<16x16xf32>
    %cst_48 = arith.constant dense<0xFF800000> : vector<16xf32>
    %143 = vector.multi_reduction <maximumf>, %142, %cst_48 [1] : vector<16x16xf32> to vector<16xf32>
    %144 = vector.shape_cast %143 : vector<16xf32> to vector<16x1xf32>
    %145 = vector.extract_strided_slice %138 {offsets = [0, 32], sizes = [16, 16], strides = [1, 1]} : vector<16x128xf32> to vector<16x16xf32>
    %cst_49 = arith.constant dense<0xFF800000> : vector<16xf32>
    %146 = vector.multi_reduction <maximumf>, %145, %cst_49 [1] : vector<16x16xf32> to vector<16xf32>
    %147 = vector.shape_cast %146 : vector<16xf32> to vector<16x1xf32>
    %148 = vector.extract_strided_slice %138 {offsets = [0, 48], sizes = [16, 16], strides = [1, 1]} : vector<16x128xf32> to vector<16x16xf32>
    %cst_50 = arith.constant dense<0xFF800000> : vector<16xf32>
    %149 = vector.multi_reduction <maximumf>, %148, %cst_50 [1] : vector<16x16xf32> to vector<16xf32>
    %150 = vector.shape_cast %149 : vector<16xf32> to vector<16x1xf32>
    %151 = vector.extract_strided_slice %138 {offsets = [0, 64], sizes = [16, 16], strides = [1, 1]} : vector<16x128xf32> to vector<16x16xf32>
    %cst_51 = arith.constant dense<0xFF800000> : vector<16xf32>
    %152 = vector.multi_reduction <maximumf>, %151, %cst_51 [1] : vector<16x16xf32> to vector<16xf32>
    %153 = vector.shape_cast %152 : vector<16xf32> to vector<16x1xf32>
    %154 = vector.extract_strided_slice %138 {offsets = [0, 80], sizes = [16, 16], strides = [1, 1]} : vector<16x128xf32> to vector<16x16xf32>
    %cst_52 = arith.constant dense<0xFF800000> : vector<16xf32>
    %155 = vector.multi_reduction <maximumf>, %154, %cst_52 [1] : vector<16x16xf32> to vector<16xf32>
    %156 = vector.shape_cast %155 : vector<16xf32> to vector<16x1xf32>
    %157 = vector.extract_strided_slice %138 {offsets = [0, 96], sizes = [16, 16], strides = [1, 1]} : vector<16x128xf32> to vector<16x16xf32>
    %cst_53 = arith.constant dense<0xFF800000> : vector<16xf32>
    %158 = vector.multi_reduction <maximumf>, %157, %cst_53 [1] : vector<16x16xf32> to vector<16xf32>
    %159 = vector.shape_cast %158 : vector<16xf32> to vector<16x1xf32>
    %160 = vector.extract_strided_slice %138 {offsets = [0, 112], sizes = [16, 16], strides = [1, 1]} : vector<16x128xf32> to vector<16x16xf32>
    %cst_54 = arith.constant dense<0xFF800000> : vector<16xf32>
    %161 = vector.multi_reduction <maximumf>, %160, %cst_54 [1] : vector<16x16xf32> to vector<16xf32>
    %162 = vector.shape_cast %161 : vector<16xf32> to vector<16x1xf32>
    %163 = tpu.concatenate %141, %144, %147, %150, %153, %156, %159, %162 in 1 : vector<16x1xf32>, vector<16x1xf32>, vector<16x1xf32>, vector<16x1xf32>, vector<16x1xf32>, vector<16x1xf32>, vector<16x1xf32>, vector<16x1xf32> -> vector<16x8xf32>
    %c0_55 = arith.constant 0 : index
    %c0_56 = arith.constant 0 : index
    %164 = vector.load %arg10[%c0_55, %c0_56] : memref<8x128xf32, #tpu.memory_space<vmem>>, vector<8x128xf32>
    %cst_57 = arith.constant dense<0.000000e+00> : vector<16x128xf32>
    %165 = tpu.matmul %163, %164, %cst_57 {dimension_numbers = #tpu.dot_dimension_numbers<[1], [0], [0], [1], [0, 0, 1, 1], [], []>} : vector<16x8xf32>, vector<8x128xf32>, vector<16x128xf32> -> vector<16x128xf32>
    %166 = arith.subf %138, %165 : vector<16x128xf32>
    %167 = math.exp %166 : vector<16x128xf32>
    %c0_58 = arith.constant 0 : index
    %c0_59 = arith.constant 0 : index
    %168 = vector.load %arg11[%c0_58, %c0_59] : memref<128x128xf32, #tpu.memory_space<vmem>>, vector<128x128xf32>
    %cst_60 = arith.constant dense<0.000000e+00> : vector<16x128xf32>
    %169 = tpu.matmul %167, %168, %cst_60 {dimension_numbers = #tpu.dot_dimension_numbers<[1], [0], [0], [1], [0, 0, 1, 1], [], []>} : vector<16x128xf32>, vector<128x128xf32>, vector<16x128xf32> -> vector<16x128xf32>
    %170 = arith.divf %167, %169 : vector<16x128xf32>
    %c0_61 = arith.constant 0 : index
    %c0_62 = arith.constant 0 : index
    %171 = vector.load %arg12[%c0_61, %c0_62] : memref<128x16xf32, #tpu.memory_space<vmem>>, vector<128x16xf32>
    %cst_63 = arith.constant dense<0.000000e+00> : vector<128x64xf32>
    %172 = tpu.matmul %171, %6, %cst_63 {dimension_numbers = #tpu.dot_dimension_numbers<[1], [0], [0], [1], [0, 0, 1, 1], [], []>} : vector<128x16xf32>, vector<16x64xf32>, vector<128x64xf32> -> vector<128x64xf32>
    %c0_64 = arith.constant 0 : index
    %c0_65 = arith.constant 0 : index
    %173 = vector.load %arg13[%c0_64, %c0_65] : memref<128x64xf32, #tpu.memory_space<vmem>>, vector<128x64xf32>
    %174 = arith.mulf %172, %173 : vector<128x64xf32>
    %cst_66 = arith.constant dense<0.000000e+00> : vector<16x64xf32>
    %175 = tpu.matmul %170, %174, %cst_66 {dimension_numbers = #tpu.dot_dimension_numbers<[1], [0], [0], [1], [0, 0, 1, 1], [], []>} : vector<16x128xf32>, vector<128x64xf32>, vector<16x64xf32> -> vector<16x64xf32>
    %c0_67 = arith.constant 0 : index
    %c0_68 = arith.constant 0 : index
    %176 = vector.load %arg5[%c0_67, %c0_68] : memref<1x64xf32, #tpu.memory_space<vmem>>, vector<1x64xf32>
    %177 = vector.broadcast %176 : vector<1x64xf32> to vector<16x64xf32>
    %178 = arith.addf %175, %177 : vector<16x64xf32>
    %cst_69 = arith.constant 0.000000e+00 : f32
    %179 = vector.broadcast %cst_69 : f32 to vector<16x64xf32>
    %180 = arith.cmpf ogt, %178, %179 : vector<16x64xf32>
    %181 = math.exp %178 : vector<16x64xf32>
    %cst_70 = arith.constant 1.000000e+00 : f32
    %182 = vector.broadcast %cst_70 : f32 to vector<16x64xf32>
    %183 = arith.subf %181, %182 : vector<16x64xf32>
    %184 = arith.select %180, %178, %183 : vector<16x64xi1>, vector<16x64xf32>
    %c0_71 = arith.constant 0 : index
    %c0_72 = arith.constant 0 : index
    %185 = vector.load %arg14[%c0_71, %c0_72] : memref<64x8xf32, #tpu.memory_space<vmem>>, vector<64x8xf32>
    %cst_73 = arith.constant dense<0.000000e+00> : vector<16x8xf32>
    %186 = tpu.matmul %184, %185, %cst_73 {dimension_numbers = #tpu.dot_dimension_numbers<[1], [0], [0], [1], [0, 0, 1, 1], [], []>} : vector<16x64xf32>, vector<64x8xf32>, vector<16x8xf32> -> vector<16x8xf32>
    %c0_74 = arith.constant 0 : index
    %c0_75 = arith.constant 0 : index
    %187 = vector.load %arg15[%c0_74, %c0_75] : memref<1x8xf32, #tpu.memory_space<vmem>>, vector<1x8xf32>
    %188 = vector.broadcast %187 : vector<1x8xf32> to vector<16x8xf32>
    %189 = arith.addf %186, %188 : vector<16x8xf32>
    %190 = vector.extract_strided_slice %189 {offsets = [0, 0], sizes = [16, 4], strides = [1, 1]} : vector<16x8xf32> to vector<16x4xf32>
    %191 = vector.extract_strided_slice %189 {offsets = [0, 4], sizes = [16, 4], strides = [1, 1]} : vector<16x8xf32> to vector<16x4xf32>
    %192 = tpu.transpose %190, [1, 0] : vector<16x4xf32> -> vector<4x16xf32>
    %c0_76 = arith.constant 0 : index
    %c0_77 = arith.constant 0 : index
    %193 = vector.load %arg17[%c0_76, %c0_77] : memref<4x16xf32, #tpu.memory_space<vmem>>, vector<4x16xf32>
    %cst_78 = arith.constant dense<0.000000e+00> : vector<16x16xf32>
    %194 = tpu.matmul %191, %193, %cst_78 {dimension_numbers = #tpu.dot_dimension_numbers<[1], [0], [0], [1], [0, 0, 1, 1], [], []>} : vector<16x4xf32>, vector<4x16xf32>, vector<16x16xf32> -> vector<16x16xf32>
    %c0_79 = arith.constant 0 : index
    %c0_80 = arith.constant 0 : index
    %195 = vector.load %arg18[%c0_79, %c0_80] : memref<1x4xf32, #tpu.memory_space<vmem>>, vector<1x4xf32>
    %cst_81 = arith.constant dense<0.000000e+00> : vector<1x16xf32>
    %196 = tpu.matmul %195, %192, %cst_81 {dimension_numbers = #tpu.dot_dimension_numbers<[1], [0], [0], [1], [0, 0, 1, 1], [], []>} : vector<1x4xf32>, vector<4x16xf32>, vector<1x16xf32> -> vector<1x16xf32>
    %197 = vector.broadcast %196 : vector<1x16xf32> to vector<16x16xf32>
    %198 = arith.addf %194, %197 : vector<16x16xf32>
    %c0_82 = arith.constant 0 : index
    %c0_83 = arith.constant 0 : index
    %199 = vector.load %arg2[%c0_82, %c0_83] : memref<16x16xf32, #tpu.memory_space<vmem>>, vector<16x16xf32>
    %200 = arith.addf %198, %199 : vector<16x16xf32>
    %201 = vector.extract_strided_slice %191 {offsets = [0, 0], sizes = [16, 1], strides = [1, 1]} : vector<16x4xf32> to vector<16x1xf32>
    %202 = vector.extract_strided_slice %192 {offsets = [0, 0], sizes = [1, 16], strides = [1, 1]} : vector<4x16xf32> to vector<1x16xf32>
    %203 = vector.broadcast %201 : vector<16x1xf32> to vector<16x16xf32>
    %204 = vector.broadcast %202 : vector<1x16xf32> to vector<16x16xf32>
    %205 = arith.addf %203, %204 : vector<16x16xf32>
    %c0_84 = arith.constant 0 : index
    %c0_85 = arith.constant 0 : index
    %206 = memref.load %arg19[%c0_84, %c0_85] : memref<1x4xf32, #tpu.memory_space<smem>>
    %cst_86 = arith.constant 0.000000e+00 : f32
    %207 = vector.broadcast %cst_86 : f32 to vector<16x16xf32>
    %208 = arith.maximumf %205, %207 : vector<16x16xf32>
    %209 = vector.broadcast %206 : f32 to vector<16x16xf32>
    %210 = arith.mulf %209, %208 : vector<16x16xf32>
    %211 = arith.addf %200, %210 : vector<16x16xf32>
    %212 = vector.extract_strided_slice %191 {offsets = [0, 1], sizes = [16, 1], strides = [1, 1]} : vector<16x4xf32> to vector<16x1xf32>
    %213 = vector.extract_strided_slice %192 {offsets = [1, 0], sizes = [1, 16], strides = [1, 1]} : vector<4x16xf32> to vector<1x16xf32>
    %214 = vector.broadcast %212 : vector<16x1xf32> to vector<16x16xf32>
    %215 = vector.broadcast %213 : vector<1x16xf32> to vector<16x16xf32>
    %216 = arith.addf %214, %215 : vector<16x16xf32>
    %c0_87 = arith.constant 0 : index
    %c1_88 = arith.constant 1 : index
    %217 = memref.load %arg19[%c0_87, %c1_88] : memref<1x4xf32, #tpu.memory_space<smem>>
    %cst_89 = arith.constant 0.000000e+00 : f32
    %218 = vector.broadcast %cst_89 : f32 to vector<16x16xf32>
    %219 = arith.maximumf %216, %218 : vector<16x16xf32>
    %220 = vector.broadcast %217 : f32 to vector<16x16xf32>
    %221 = arith.mulf %220, %219 : vector<16x16xf32>
    %222 = arith.addf %211, %221 : vector<16x16xf32>
    %223 = vector.extract_strided_slice %191 {offsets = [0, 2], sizes = [16, 1], strides = [1, 1]} : vector<16x4xf32> to vector<16x1xf32>
    %224 = vector.extract_strided_slice %192 {offsets = [2, 0], sizes = [1, 16], strides = [1, 1]} : vector<4x16xf32> to vector<1x16xf32>
    %225 = vector.broadcast %223 : vector<16x1xf32> to vector<16x16xf32>
    %226 = vector.broadcast %224 : vector<1x16xf32> to vector<16x16xf32>
    %227 = arith.addf %225, %226 : vector<16x16xf32>
    %c0_90 = arith.constant 0 : index
    %c2_91 = arith.constant 2 : index
    %228 = memref.load %arg19[%c0_90, %c2_91] : memref<1x4xf32, #tpu.memory_space<smem>>
    %cst_92 = arith.constant 0.000000e+00 : f32
    %229 = vector.broadcast %cst_92 : f32 to vector<16x16xf32>
    %230 = arith.maximumf %227, %229 : vector<16x16xf32>
    %231 = vector.broadcast %228 : f32 to vector<16x16xf32>
    %232 = arith.mulf %231, %230 : vector<16x16xf32>
    %233 = arith.addf %222, %232 : vector<16x16xf32>
    %234 = vector.extract_strided_slice %191 {offsets = [0, 3], sizes = [16, 1], strides = [1, 1]} : vector<16x4xf32> to vector<16x1xf32>
    %235 = vector.extract_strided_slice %192 {offsets = [3, 0], sizes = [1, 16], strides = [1, 1]} : vector<4x16xf32> to vector<1x16xf32>
    %236 = vector.broadcast %234 : vector<16x1xf32> to vector<16x16xf32>
    %237 = vector.broadcast %235 : vector<1x16xf32> to vector<16x16xf32>
    %238 = arith.addf %236, %237 : vector<16x16xf32>
    %c0_93 = arith.constant 0 : index
    %c3_94 = arith.constant 3 : index
    %239 = memref.load %arg19[%c0_93, %c3_94] : memref<1x4xf32, #tpu.memory_space<smem>>
    %cst_95 = arith.constant 0.000000e+00 : f32
    %240 = vector.broadcast %cst_95 : f32 to vector<16x16xf32>
    %241 = arith.maximumf %238, %240 : vector<16x16xf32>
    %242 = vector.broadcast %239 : f32 to vector<16x16xf32>
    %243 = arith.mulf %242, %241 : vector<16x16xf32>
    %244 = arith.addf %233, %243 : vector<16x16xf32>
    %cst_96 = arith.constant dense<0xFF800000> : vector<16xf32>
    %245 = vector.multi_reduction <maximumf>, %244, %cst_96 [1] : vector<16x16xf32> to vector<16xf32>
    %246 = vector.shape_cast %245 : vector<16xf32> to vector<16x1xf32>
    %247 = vector.broadcast %246 : vector<16x1xf32> to vector<16x16xf32>
    %248 = arith.subf %244, %247 : vector<16x16xf32>
    %249 = math.exp %248 : vector<16x16xf32>
    %cst_97 = arith.constant dense<0.000000e+00> : vector<16xf32>
    %250 = vector.multi_reduction <add>, %249, %cst_97 [1] : vector<16x16xf32> to vector<16xf32>
    %251 = vector.shape_cast %250 : vector<16xf32> to vector<16x1xf32>
    %252 = vector.broadcast %251 : vector<16x1xf32> to vector<16x16xf32>
    %253 = arith.divf %249, %252 : vector<16x16xf32>
    %cst_98 = arith.constant dense<0.000000e+00> : vector<16x4xf32>
    %254 = tpu.matmul %253, %190, %cst_98 {dimension_numbers = #tpu.dot_dimension_numbers<[1], [0], [0], [1], [0, 0, 1, 1], [], []>} : vector<16x16xf32>, vector<16x4xf32>, vector<16x4xf32> -> vector<16x4xf32>
    %c0_99 = arith.constant 0 : index
    %c0_100 = arith.constant 0 : index
    %255 = vector.load %arg16[%c0_99, %c0_100] : memref<1x4xf32, #tpu.memory_space<vmem>>, vector<1x4xf32>
    %256 = vector.broadcast %255 : vector<1x4xf32> to vector<16x4xf32>
    %257 = arith.addf %254, %256 : vector<16x4xf32>
    %c0_101 = arith.constant 0 : index
    %c0_102 = arith.constant 0 : index
    %258 = vector.load %arg20[%c0_101, %c0_102] : memref<16x4xf32, #tpu.memory_space<vmem>>, vector<16x4xf32>
    tpu.vector_store %arg20[%c0_101, %c0_102], %257 {strides = array<i32>} : memref<16x4xf32, #tpu.memory_space<vmem>>, vector<16x4xf32>,
    return
  }
}

</mosaic_0001>

<bundles_post_ra>
// kernel: tpu_custom_call.1
= control target key start
LH: loop header
LB: loop body
LE: loop exit
PB: predicated region body
PF: predicated region fallthrough
CT: control target
= control target key end

     0   :  { %s3195_s0 = inlined_call_operand.vmem [shape: f32[16,16], index: 0, kind: input, shape index: {}]   ;;  %s3196_s1 = inlined_call_operand.vmem [shape: f32[16,128], index: 1, kind: input, shape index: {}]   ;;  %s3197_s2 = inlined_call_operand.vmem [shape: f32[16,16], index: 2, kind: input, shape index: {}]   ;;  %s3198_s3 = inlined_call_operand.vmem [shape: f32[16,128], index: 3, kind: input, shape index: {}]   ;;  %s3199_s4 = inlined_call_operand.vmem [shape: f32[1,128], index: 4, kind: input, shape index: {}]   ;;  %s3200_s5 = inlined_call_operand.vmem [shape: f32[1,64], index: 5, kind: input, shape index: {}]   ;;  %s3201_s6 = inlined_call_operand.vmem [shape: f32[64,128], index: 6, kind: input, shape index: {}]   ;;  %s3202_s7 = inlined_call_operand.hbm [shape: f32[64,1024], index: 7, kind: input, shape index: {}]   ;;  %s3203_s8 = inlined_call_operand.vmem [shape: f32[8,128], index: 8, kind: input, shape index: {}]   ;;  %s3204_s9 = inlined_call_operand.vmem [shape: f32[8,128], index: 9, kind: input, shape index: {}]   ;;  %s3205_s10 = inlined_call_operand.vmem [shape: f32[8,128], index: 10, kind: input, shape index: {}]   ;;  %s3206_s11 = inlined_call_operand.vmem [shape: f32[128,128], index: 11, kind: input, shape index: {}]   ;;  %s3207_s12 = inlined_call_operand.vmem [shape: f32[128,16], index: 12, kind: input, shape index: {}]   ;;  %s3208_s13 = inlined_call_operand.vmem [shape: f32[128,64], index: 13, kind: input, shape index: {}]   ;;  %s3209_s14 = inlined_call_operand.vmem [shape: f32[64,8], index: 14, kind: input, shape index: {}]   ;;  %s3210_s15 = inlined_call_operand.vmem [shape: f32[1,8], index: 15, kind: input, shape index: {}]   ;;  %s3211_s16 = inlined_call_operand.vmem [shape: f32[1,4], index: 16, kind: input, shape index: {}]   ;;  %s3212_s17 = inlined_call_operand.vmem [shape: f32[4,16], index: 17, kind: input, shape index: {}]   ;;  %s3213_s18 = inlined_call_operand.vmem [shape: f32[1,4], index: 18, kind: input, shape index: {}]   ;;  %s3214_s19 = inlined_call_operand.vmem [shape: f32[1,4], index: 19, kind: input, shape index: {}]   ;;  %s3215_s20 = inlined_call_operand.vmem [shape: f32[16,4], index: 20, kind: output, shape index: {}]  }
   0x1   :  { %3220 = sst [smem:[#allocation8_spill]] %s3195_s0 }
   0x2   :  { %3221 = sst [smem:[#allocation9_spill]] %s3196_s1 }
   0x3   :  { %3222 = sst [smem:[#allocation10_spill]] %s3197_s2 }
   0x4   :  { %3223 = sst [smem:[#allocation11_spill]] %s3198_s3 }
   0x5   :  { %3224 = sst [smem:[#allocation12_spill]] %s3199_s4 }
   0x6   :  { %25 = vsyncpa [#allocation3], 0 }
   0x7   :  { %26 = vsyncpa [#allocation4], 0  ;;  %s2571_s1 = smov [#allocation2]   ;;  %s81_s2 = sshll.u32 %s3214_s19, 4  ;;  %s82_s2 = int_to_ptr.vmem [resolvable:$true] %s81_s2 }
   0x8   :  { %s46_s22 = sshll.u32 %s2571_s1, 4  ;;  %s2533_s26 = scalar_lea.hbm %s3202_s7, 8192  ;;  %s47_s22 = int_to_ptr.vmem [resolvable:$true] %s46_s22 }
   0x9   :  { %p2534_p0 = scmp.ne.s32.totalorder %s3202_s7, %s2533_s26  ;;  %p2537_p1 = scmp.lt.u32.totalorder %s2533_s26, %s3202_s7 }
   0xb   :  { %p2539_p2 = pnand %p2537_p1, %p2534_p0 }
   0xd   :  { %2542 = shalt.err (!%p2539_p2)
}
   0xe   :  { %s2543_s30 = scalar_lea.vmem %s47_s22, 8192  ;;  %p2548_p4 = scmp.lt.s32.totalorder %s47_s22, %s47_s22 }
   0xf   :  { %p2544_p3 = scmp.ne.s32.totalorder %s47_s22, %s2543_s30  ;;  %p2549_p5 = scmp.lt.s32.totalorder %s2543_s30, %s2543_s30 }
  0x11   :  { %p2550_p6 = por %p2549_p5, %p2548_p4 }
  0x13   :  { %p2551_p7 = pnand %p2550_p6, %p2544_p3 }
  0x15   :  { %2554 = shalt.err (!%p2551_p7)
}
  0x16   :  { %s2572_s19 = smov 1024   ;;  %s2573_s0 = smov 64  }
  0x17   :  { %52 = dma.hbm_to_vmem [thread:$0]  %s3202_s7, 8192, %s47_s22, [#allocation3], %s2572_s19, %s2572_s19, %s2573_s0  }
  0x18   :  { %s2555_s23 = scalar_lea.vmem %s82_s2, 16  ;;  %p2560_p9 = scmp.lt.s32.totalorder %s82_s2, %s82_s2 }
  0x19   :  { %p2556_p8 = scmp.ne.s32.totalorder %s82_s2, %s2555_s23  ;;  %p2561_p10 = scmp.lt.s32.totalorder %s2555_s23, %s2555_s23 }
  0x1b   :  { %p2562_p11 = por %p2561_p10, %p2560_p9 }
  0x1d   :  { %p2563_p12 = pnand %p2562_p11, %p2556_p8 }
  0x1f   :  { %2566 = shalt.err (!%p2563_p12)
}
  0x20   :  { %s2574_s24 = smov [#allocation5]  }
  0x21   :  { %84 = dma.vmem_to_smem %s82_s2, 16, %s2574_s24, [#allocation4]  }
  0x22   :  { %2567 = dma.done.wait [#allocation3], 8192  }
  0x23   :  { %2568 = vsyncadd [#allocation3], 4294959104 }
  0x24   :  { %2569 = dma.done.wait [#allocation4], 16  }
  0x25   :  { %2570 = vsyncadd [#allocation4], 4294967280 }
  0x26   :  { %91 = sfence }
  0x27   :  { %s3225_s26 = sld [smem:[#allocation11_spill]]  ;;  %s3226_s4 = sld [smem:[#allocation8_spill]]  ;;  %vm103_vm0 = vcmask 130048   ;;  %v259_v5 = vld [vmem:[#allocation2 + $0x8] sm:$0xff]  ;;  %v261_v7 = vld [vmem:[#allocation2 + $0x18] sm:$0xff]  ;;  %v258_v10 = vld [vmem:[#allocation2] sm:$0xff] }
  0x28   :  { %v267_v6 = vld [vmem:[#allocation2 + $0x48] sm:$0xff]  ;;  %v269_v9 = vld [vmem:[#allocation2 + $0x58] sm:$0xff]  ;;  %v266_v11 = vld [vmem:[#allocation2 + $0x40] sm:$0xff]  ;;  %v2575_v12 = vmov 0.0   ;;  %s3227_s21 = sld [smem:[#allocation12_spill]]  ;;  %vm250_vm1 = vcmask 523264  }
  0x29   :  { %v2323_v8 = vpack.c.bf16 %v267_v6, %v259_v5  ;;  %396 = vmatprep.mubr.f32.mxu1 %v2575_v12  ;;  %v2339_v13 = vpack.c.bf16 %v269_v9, %v261_v7  ;;  %v2325_v14 = vpack.c.bf16 %v266_v11, %v258_v10  ;;  %v260_v15 = vld [vmem:[#allocation2 + $0x10] sm:$0xff]  ;;  %v275_v17 = vld [vmem:[#allocation2 + $0x88] sm:$0xff]  ;;  %v277_v20 = vld [vmem:[#allocation2 + $0x98] sm:$0xff]  ;;  %s2576_s29 = smov 16   ;;  %s2577_s23 = smov 32   ;;  %vm246_vm2 = vcmask 261120  }
  0x2a   :  { %v268_v16 = vld [vmem:[#allocation2 + $0x50] sm:$0xff]  ;;  %v283_v19 = vld [vmem:[#allocation2 + $0xc8] sm:$0xff]  ;;  %v285_v21 = vld [vmem:[#allocation2 + $0xd8] sm:$0xff]  ;;  %s2578_s24 = smov 48   ;;  %s2580_s25 = smov 96   ;;  %vm248_vm3 = vcmask 392192  }
  0x2b   :  { %2324 = vmatprep.subr.bf16.mxu1 %v2323_v8  ;;  %v2341_v18 = vpack.c.bf16 %v268_v16, %v260_v15  ;;  %v2327_v22 = vpack.c.bf16 %v283_v19, %v275_v17  ;;  %v2343_v23 = vpack.c.bf16 %v285_v21, %v277_v20  ;;  %v274_v24 = vld [vmem:[#allocation2 + $0x80] sm:$0xff]  ;;  %v276_v26 = vld [vmem:[#allocation2 + $0x90] sm:$0xff]  ;;  %v291_v29 = vld [vmem:[#allocation2 + $0x108] sm:$0xff]  ;;  %s2581_s3 = smov 112   ;;  %vm252_vm4 = vcmask 654336   ;;  %s2583_s22 = smov 124  }
  0x2c   :  { %2326 = vmatpush1.bf16.msra.mxu1 %v2325_v14  ;;  %v282_v25 = vld [vmem:[#allocation2 + $0xc0] sm:$0xff]  ;;  %v284_v28 = vld [vmem:[#allocation2 + $0xd0] sm:$0xff]  ;;  %v299_v30 = vld [vmem:[#allocation2 + $0x148] sm:$0xff]  ;;  %vm254_vm5 = vcmask 785408   ;;  %vm256_vm6 = vcmask 916480   ;;  %vm940_vm7 = vcmask 786048  }
  0x2d   :  { %v94_v0 = vld [vmem:[%s3225_s26] sm:$0xff]  ;;  %v95_v1 = vld [vmem:[%s3225_s26 + $0x8] sm:$0xff]  ;;  %v2329_v27 = vpack.c.bf16 %v282_v25, %v274_v24  ;;  %2328 = vmatprep.subr.bf16.mxu1 %v2327_v22  ;;  %v2345_v31 = vpack.c.bf16 %v284_v28, %v276_v26  ;;  %v2331_v32 = vpack.c.bf16 %v299_v30, %v291_v29  ;;  %v293_v33 = vld [vmem:[#allocation2 + $0x118] sm:$0xff]  ;;  %vm912_vm8 = vcmask 261248  }
  0x2e   :  { %v92_v2 = vld [vmem:[%s3226_s4] sm:$0xff]  ;;  %v2319_v3 = vpack.c.bf16 %v95_v1, %v94_v0  ;;  %v93_v4 = vld [vmem:[%s3226_s4 + $0x8] sm:$0xff]  ;;  %v301_v34 = vld [vmem:[#allocation2 + $0x158] sm:$0xff]  ;;  %vm919_vm9 = vcmask 392448   ;;  %vm947_vm10 = vcmask 917248   ;;  %vm926_vm11 = vcmask 523648  }
  0x2f   :  { %2158 = vmatprep.mubr.msk.f32.mxu0 %vm103_vm0, %v92_v2  ;;  %v290_v35 = vld [vmem:[#allocation2 + $0x100] sm:$0xff]  ;;  %v2347_v36 = vpack.c.bf16 %v301_v34, %v293_v33  ;;  %v292_v38 = vld [vmem:[#allocation2 + $0x110] sm:$0xff]  ;;  %v307_v41 = vld [vmem:[#allocation2 + $0x188] sm:$0xff]  ;;  %vm954_vm12 = vcmask 1048448   ;;  %vm933_vm13 = vcmask 654848   ;;  %vm961_vm14 = vcmask 7168  }
  0x30   :  { %2320 = vmatprep.subr.bf16.mxu0 %v2319_v3  ;;  %v298_v37 = vld [vmem:[#allocation2 + $0x140] sm:$0xff]  ;;  %v300_v39 = vld [vmem:[#allocation2 + $0x150] sm:$0xff]  ;;  %2330 = vmatpush1.bf16.msra.mxu1 %v2329_v27  ;;  %v315_v42 = vld [vmem:[#allocation2 + $0x1c8] sm:$0xff]  ;;  %vm964_vm15 = vcmask 15360  }
  0x31   :  { %2322 = vmatpush3.bf16.msra.mxu0 %v2319_v3  ;;  %v2333_v40 = vpack.c.bf16 %v298_v37, %v290_v35  ;;  %v309_v43 = vld [vmem:[#allocation2 + $0x198] sm:$0xff]  ;;  %2332 = vmatprep.subr.bf16.mxu1 %v2331_v32  ;;  %v2349_v44 = vpack.c.bf16 %v300_v39, %v292_v38  ;;  %v2335_v45 = vpack.c.bf16 %v315_v42, %v307_v41  ;;  %v306_v47 = vld [vmem:[#allocation2 + $0x180] sm:$0xff]  ;;  %v308_v50 = vld [vmem:[#allocation2 + $0x190] sm:$0xff] }
  0x32   :  { %2340 = vmatprep.subr.bf16.mxu0 %v2339_v13  ;;  %v317_v46 = vld [vmem:[#allocation2 + $0x1d8] sm:$0xff]  ;;  %v314_v48 = vld [vmem:[#allocation2 + $0x1c0] sm:$0xff]  ;;  %v316_v51 = vld [vmem:[#allocation2 + $0x1d0] sm:$0xff] }
  0x33   :  { %v2351_v49 = vpack.c.bf16 %v317_v46, %v309_v43  ;;  %v263_v52 = vld [vmem:[#allocation2 + $0x28] sm:$0xff]  ;;  %v265_v54 = vld [vmem:[#allocation2 + $0x38] sm:$0xff]  ;;  %v2337_v56 = vpack.c.bf16 %v314_v48, %v306_v47  ;;  %v2353_v57 = vpack.c.bf16 %v316_v51, %v308_v50  ;;  %v2008_v60 = vld [vmem:[%s3227_s21] ss:$0 sm:$0xff] }
  0x34   :  { %2159 = vmatmul.mubr.msk.f32.vlgmr.msra.gmra.mrb[0].mxu0 %vm103_vm0, %v93_v4  ;;  %v271_v53 = vld [vmem:[#allocation2 + $0x68] sm:$0xff]  ;;  %v273_v55 = vld [vmem:[#allocation2 + $0x78] sm:$0xff]  ;;  %2334 = vmatpush1.bf16.msra.mxu1 %v2333_v40  ;;  %v262_v2 = vld [vmem:[#allocation2 + $0x20] sm:$0xff] }
  0x35   :  { %473 = vmatprep.mubr.f32.mxu0 %v2575_v12  ;;  %2342 = vmatpush1.bf16.msra.mxu0 %v2341_v18  ;;  %v2355_v58 = vpack.c.bf16 %v271_v53, %v263_v52  ;;  %v2371_v59 = vpack.c.bf16 %v273_v55, %v265_v54  ;;  %v270_v3 = vld [vmem:[#allocation2 + $0x60] sm:$0xff]  ;;  %v264_v4 = vld [vmem:[#allocation2 + $0x30] sm:$0xff]  ;;  %v279_v6 = vld [vmem:[#allocation2 + $0xa8] sm:$0xff] }
  0x36   :  { %2344 = vmatprep.subr.bf16.mxu0 %v2343_v23  ;;  %2336 = vmatprep.subr.bf16.mxu1 %v2335_v45  ;;  %v272_v5 = vld [vmem:[#allocation2 + $0x70] sm:$0xff]  ;;  %v287_v7 = vld [vmem:[#allocation2 + $0xe8] sm:$0xff]  ;;  %v281_v8 = vld [vmem:[#allocation2 + $0xb8] sm:$0xff]  ;;  %v2357_v10 = vpack.c.bf16 %v270_v3, %v262_v2 }
  0x37   :  { %v289_v9 = vld [vmem:[#allocation2 + $0xf8] sm:$0xff]  ;;  %v2373_v11 = vpack.c.bf16 %v272_v5, %v264_v4  ;;  %v278_v13 = vld [vmem:[#allocation2 + $0xa0] sm:$0xff]  ;;  %v280_v15 = vld [vmem:[#allocation2 + $0xb0] sm:$0xff]  ;;  %v2359_v19 = vpack.c.bf16 %v287_v7, %v279_v6 }
  0x38   :  { %2338 = vmatpush1.bf16.msra.mxu1 %v2337_v56  ;;  %v286_v14 = vld [vmem:[#allocation2 + $0xe0] sm:$0xff]  ;;  %v288_v16 = vld [vmem:[#allocation2 + $0xf0] sm:$0xff]  ;;  %v295_v17 = vld [vmem:[#allocation2 + $0x128] sm:$0xff]  ;;  %v2375_v20 = vpack.c.bf16 %v289_v9, %v281_v8 }
  0x39   :  { %2346 = vmatpush1.bf16.msra.mxu0 %v2345_v31  ;;  %2356 = vmatprep.subr.bf16.mxu1 %v2355_v58  ;;  %v303_v21 = vld [vmem:[#allocation2 + $0x168] sm:$0xff]  ;;  %v297_v22 = vld [vmem:[#allocation2 + $0x138] sm:$0xff]  ;;  %v2361_v24 = vpack.c.bf16 %v286_v14, %v278_v13  ;;  %v2377_v25 = vpack.c.bf16 %v288_v16, %v280_v15  ;;  %v294_v26 = vld [vmem:[#allocation2 + $0x120] sm:$0xff] }
  0x3a   :  { %2348 = vmatprep.subr.bf16.mxu0 %v2347_v36  ;;  %v305_v23 = vld [vmem:[#allocation2 + $0x178] sm:$0xff]  ;;  %v302_v27 = vld [vmem:[#allocation2 + $0x160] sm:$0xff]  ;;  %v2363_v28 = vpack.c.bf16 %v303_v21, %v295_v17  ;;  %v296_v30 = vld [vmem:[#allocation2 + $0x130] sm:$0xff] }
  0x3b   :  { %v2379_v29 = vpack.c.bf16 %v305_v23, %v297_v22  ;;  %v304_v31 = vld [vmem:[#allocation2 + $0x170] sm:$0xff]  ;;  %v311_v32 = vld [vmem:[#allocation2 + $0x1a8] sm:$0xff]  ;;  %v313_v35 = vld [vmem:[#allocation2 + $0x1b8] sm:$0xff]  ;;  %v2365_v37 = vpack.c.bf16 %v302_v27, %v294_v26 }
  0x3c   :  { %v319_v34 = vld [vmem:[#allocation2 + $0x1e8] sm:$0xff]  ;;  %v321_v36 = vld [vmem:[#allocation2 + $0x1f8] sm:$0xff]  ;;  %v2381_v38 = vpack.c.bf16 %v304_v31, %v296_v30  ;;  %v310_v39 = vld [vmem:[#allocation2 + $0x1a0] sm:$0xff] }
  0x3d   :  { %2350 = vmatpush1.bf16.msra.mxu0 %v2349_v44  ;;  %v2367_v40 = vpack.c.bf16 %v319_v34, %v311_v32  ;;  %v2383_v41 = vpack.c.bf16 %v321_v36, %v313_v35  ;;  %v318_v42 = vld [vmem:[#allocation2 + $0x1e0] sm:$0xff]  ;;  %v312_v43 = vld [vmem:[#allocation2 + $0x1b0] sm:$0xff]  ;;  %v641_v46 = vld [vmem:[%s3201_s6 + $0x8] sm:$0xff] }
  0x3e   :  { %2352 = vmatprep.subr.bf16.mxu0 %v2351_v49  ;;  %v320_v44 = vld [vmem:[#allocation2 + $0x1f0] sm:$0xff]  ;;  %v640_v45 = vld [vmem:[%s3201_s6] sm:$0xff]  ;;  %v2369_v47 = vpack.c.bf16 %v318_v42, %v310_v39  ;;  %v643_v51 = vld [vmem:[%s3201_s6 + $0x18] sm:$0xff]  ;;  %v687_v42 = vlaneseq }
  0x3f   :  { %v2385_v48 = vpack.c.bf16 %v320_v44, %v312_v43  ;;  %v2387_v49 = vpack.c.bf16 %v641_v46, %v640_v45  ;;  %v642_v50 = vld [vmem:[%s3201_s6 + $0x10] sm:$0xff]  ;;  %v644_v54 = vld [vmem:[%s3201_s6 + $0x20] sm:$0xff]  ;;  %v645_v55 = vld [vmem:[%s3201_s6 + $0x28] sm:$0xff] }
  0x40   :  { %v2391_v53 = vpack.c.bf16 %v643_v51, %v642_v50  ;;  %v646_v58 = vld [vmem:[%s3201_s6 + $0x30] sm:$0xff]  ;;  %v662_v36 = vld [vmem:[%s3203_s8 + $0x3] sm:$0x1]  ;;  %v672_v45 = vld [vmem:[%s3203_s8 + $0x5] sm:$0x1] }
  0x41   :  { %2354 = vmatpush1.bf16.msra.mxu0 %v2353_v57  ;;  %v2395_v57 = vpack.c.bf16 %v645_v55, %v644_v54  ;;  %v677_v54 = vld [vmem:[%s3203_s8 + $0x6] sm:$0x1] }
  0x42   :  { %2372 = vmatprep.subr.bf16.mxu0 %v2371_v59  ;;  %v647_v59 = vld [vmem:[%s3201_s6 + $0x38] sm:$0xff]  ;;  %s2579_s6 = smov 80  }
 0x107   :  { %v2160_v61 = vpop.f32.mrb[0].mxu0 }
 0x108   :  { %v182_v62 = vadd.f32 %v2160_v61, %v2008_v60  ;;  %v176_v63 = vpop.f32.mrb[1].mxu0  ;;  %v2399_v61 = vpack.c.bf16 %v647_v59, %v646_v58 }
 0x109   :  { %v177_v0 = vadd.f32 %v2008_v60, %v176_v63 }
 0x10b   :  { %185 = vxpose.xlu1.b32.start [1/2] (short) (narrow) %v177_v0, 64  ;;  %324 = vrot.lane.b32.xlu0 %v177_v0, %s2573_s0  ;;  %v2729_v1 = vpack.c.bf16 %v182_v62, %v177_v0 }
 0x10f   :  { %186 = vxpose.xlu1.b32.end [2/2] (short) (narrow) %v182_v62, 64  ;;  %326 = vrot.lane.b32.xlu0 %v182_v62, %s2573_s0 }
 0x17d   :  { %v2732_v18 = vpop.permute.xlu0 %324 }
 0x17e   :  { %2011 = vmatmul.mubr.msk.f32.vlgmr.msra.gmra.mrb[0].mxu1 %vm250_vm1, %v2732_v18  ;;  %2013 = vmatmul.mubr.msk.f32.vlgmr.msra.gmra.mrb[2].mxu0 %vm250_vm1, %v2732_v18 }
 0x17f   :  { %2358 = vmatpush1.bf16.msra.mxu1 %v2357_v10  ;;  %2374 = vmatpush1.bf16.msra.mxu0 %v2373_v11 }
 0x180   :  { %402 = vmatprep.mubr.f32.mxu1 %v2575_v12  ;;  %479 = vmatprep.mubr.f32.mxu0 %v2575_v12 }
 0x181   :  { %2360 = vmatprep.subr.bf16.mxu1 %v2359_v19  ;;  %2376 = vmatprep.subr.bf16.mxu0 %v2375_v20  ;;  %v2740_v33 = vpop.permute.xlu0 %326  ;;  %v651_v19 = vld [vmem:[%s3203_s8 + $0x1] sm:$0x1]  ;;  %v648_v20 = vld [vmem:[%s3203_s8] sm:$0x1] }
 0x182   :  { %2012 = vmatmul.mubr.msk.f32.gmra.mrb[2].mxu1 %vm250_vm1, %v2740_v33  ;;  %2014 = vmatmul.mubr.msk.f32.gmra.mrb[4].mxu0 %vm250_vm1, %v2740_v33 }
 0x183   :  { %2362 = vmatpush1.bf16.msra.mxu1 %v2361_v24  ;;  %2378 = vmatpush1.bf16.msra.mxu0 %v2377_v25 }
 0x184   :  { %2364 = vmatprep.subr.bf16.mxu1 %v2363_v28  ;;  %2380 = vmatprep.subr.bf16.mxu0 %v2379_v29  ;;  %v657_v28 = vld [vmem:[%s3203_s8 + $0x2] sm:$0x1] }
 0x185   :  { %550 = vmatprep.mubr.f32.mxu1 %v2575_v12  ;;  %627 = vmatprep.mubr.f32.mxu0 %v2575_v12 }
 0x187   :  { %2366 = vmatpush1.bf16.msra.mxu1 %v2365_v37  ;;  %2382 = vmatpush1.bf16.msra.mxu0 %v2381_v38 }
 0x188   :  { %2368 = vmatprep.subr.bf16.mxu1 %v2367_v40  ;;  %2384 = vmatprep.subr.bf16.mxu0 %v2383_v41  ;;  %v667_v40 = vld [vmem:[%s3203_s8 + $0x4] sm:$0x1] }
 0x18b   :  { %2370 = vmatpush1.bf16.msra.mxu1 %v2369_v47  ;;  %2386 = vmatpush1.bf16.msra.mxu0 %v2385_v48  ;;  %v201_v52 = vpop.trf.xlu1 }
 0x18c   :  { %2388 = vmatprep.subr.bf16.mxu1 %v2387_v49 }
 0x18e   :  { %2015 = vmatmul.mubr.msk.f32.vlgmr.msra.gmra.mrb[4].mxu1 %vm250_vm1, %v2732_v18  ;;  %2017 = vmatmul.mubr.msk.f32.vlgmr.msra.gmra.mrb[6].mxu0 %vm250_vm1, %v2732_v18 }
 0x18f   :  { %2390 = vmatpush3.bf16.msra.mxu1 %v2387_v49  ;;  %v202_v56 = vpop.trf.xlu1  ;;  %556 = vmatprep.mubr.f32.mxu1 %v2575_v12  ;;  %v2823_v49 = vshrl.u32 %v687_v42, 7  ;;  %v2022_v42 = vld [vmem:[%s3204_s9 + $0x1] ss:$0 sm:$0xff] }
 0x190   :  { %218 = vrot.lane.b32.xlu0 %v202_v56, %s2576_s29  ;;  %633 = vmatprep.mubr.f32.mxu0 %v2575_v12  ;;  %s3229_s29 = sld [smem:[#allocation10_spill]] }
 0x191   :  { %2392 = vmatprep.subr.bf16.mxu1 %v2391_v53  ;;  %v2836_v58 = vsub.s32 0, %v2823_v49 }
 0x192   :  { %2016 = vmatmul.mubr.msk.f32.gmra.mrb[6].mxu1 %vm250_vm1, %v2740_v33  ;;  %2018 = vmatmul.mubr.msk.f32.gmra.mrb[8].mxu0 %vm250_vm1, %v2740_v33 }
 0x193   :  { %2394 = vmatpush3.bf16.msra.mxu1 %v2391_v53  ;;  %2177 = vmatprep.mubr.msk.f32.mxu1 %vm250_vm1, %v2732_v18  ;;  %v203_v60 = vpop.trf.xlu1 }
 0x194   :  { %222 = vrot.lane.b32.xlu1 %v203_v60, %s2577_s23  ;;  %2396 = vmatprep.subr.bf16.mxu1 %v2395_v57 }
 0x197   :  { %2398 = vmatpush3.bf16.msra.mxu1 %v2395_v57  ;;  %v204_v62 = vpop.trf.xlu1 }
 0x198   :  { %226 = vrot.lane.b32.xlu0 %v204_v62, %s2578_s24  ;;  %2400 = vmatprep.subr.bf16.mxu1 %v2399_v61 }
 0x19b   :  { %2402 = vmatpush3.bf16.msra.mxu1 %v2399_v61  ;;  %v205_v63 = vpop.trf.xlu1 }
 0x19c   :  { %2436 = vmatprep.subr.bf16.mxu1 %v2729_v1  ;;  %230 = vrot.lane.b32.xlu0 %v205_v63, %s2573_s0  ;;  %v682_v63 = vld [vmem:[%s3203_s8 + $0x7] sm:$0x1] }
 0x19e   :  { %2178 = vmatmul.mubr.msk.f32.vlgmr.msra.gmra.mrb[8].mxu1 %vm250_vm1, %v2740_v33 }
 0x19f   :  { %2438 = vmatpush3.bf16.msra.mxu1 %v2729_v1  ;;  %v206_v0 = vpop.trf.xlu1 }
 0x1a0   :  { %234 = vrot.lane.b32.xlu0 %v206_v0, %s2579_s6  ;;  %v789_v0 = vsub.s32 1, %v2823_v49 }
 0x1a3   :  { %v207_v2 = vpop.trf.xlu1 }
 0x1a4   :  { %238 = vrot.lane.b32.xlu0 %v207_v2, %s2580_s25 }
 0x1a7   :  { %v208_v3 = vpop.trf.xlu1 }
 0x1a8   :  { %242 = vrot.lane.b32.xlu0 %v208_v3, %s2581_s3  ;;  %s3228_s3 = sld [smem:[#allocation9_spill]] }
 0x202   :  { %v219_v4 = vpop.permute.xlu0 %218 }
 0x203   :  { %v245_v10 = vsel %vm103_vm0, %v201_v52, %v219_v4  ;;  %v806_v4 = vsub.s32 2, %v2823_v49 }
 0x206   :  { %v223_v9 = vpop.permute.xlu1 %222 }
 0x207   :  { %v247_v1 = vsel %vm246_vm2, %v245_v10, %v223_v9  ;;  %vm967_vm2 = vcmask 23552  }
 0x20a   :  { %v227_v5 = vpop.permute.xlu0 %226 }
 0x20b   :  { %v249_v11 = vsel %vm248_vm3, %v247_v1, %v227_v5  ;;  %v840_v1 = vsub.s32 4, %v2823_v49  ;;  %vm970_vm3 = vcmask 31744  }
 0x20e   :  { %v231_v6 = vpop.permute.xlu0 %230 }
 0x20f   :  { %v251_v13 = vsel %vm250_vm1, %v249_v11, %v231_v6  ;;  %v874_v11 = vsub.s32 6, %v2823_v49 }
 0x212   :  { %v235_v7 = vpop.permute.xlu0 %234 }
 0x213   :  { %v253_v15 = vsel %vm252_vm4, %v251_v13, %v235_v7  ;;  %v823_v7 = vsub.s32 3, %v2823_v49  ;;  %vm973_vm4 = vcmask 39936  }
 0x216   :  { %v239_v8 = vpop.permute.xlu0 %238 }
 0x217   :  { %v255_v16 = vsel %vm254_vm5, %v253_v15, %v239_v8  ;;  %v857_v15 = vsub.s32 5, %v2823_v49  ;;  %vm976_vm5 = vcmask 48128  }
 0x21a   :  { %v243_v14 = vpop.permute.xlu0 %242 }
 0x21b   :  { %v2791_v17 = vsel %vm256_vm6, %v255_v16, %v243_v14  ;;  %vm979_vm6 = vcmask 56320  }
 0x21c   :  { %v653_v18 = vrot.slane %v2791_v17, 1  ;;  %v649_v26 = vmul.f32 %v648_v20, %v2791_v17  ;;  %v658_v27 = vrot.slane %v2791_v17, 2  ;;  %v663_v35 = vrot.slane %v2791_v17, 3 }
 0x21d   :  { %v668_v39 = vrot.slane %v2791_v17, 4  ;;  %v673_v44 = vrot.slane %v2791_v17, 5  ;;  %v678_v53 = vrot.slane %v2791_v17, 6  ;;  %v683_v62 = vrot.slane %v2791_v17, 7 }
 0x21e   :  { %v655_v21 = vmul.f32 %v653_v18, %v651_v19  ;;  %v660_v34 = vmul.f32 %v658_v27, %v657_v28  ;;  %v665_v38 = vmul.f32 %v663_v35, %v662_v36  ;;  %v773_v3 = vrot.slane %v2791_v17, %v2836_v58 }
 0x21f   :  { %v670_v43 = vmul.f32 %v668_v39, %v667_v40  ;;  %v675_v52 = vmul.f32 %v673_v44, %v672_v45  ;;  %v680_v61 = vmul.f32 %v678_v53, %v677_v54  ;;  %v685_v5 = vmul.f32 %v683_v62, %v682_v63 }
 0x220   :  { %v656_v29 = vadd.f32 %v655_v21, %v649_v26  ;;  %v790_v6 = vrot.slane %v2791_v17, %v789_v0  ;;  %v807_v13 = vrot.slane %v2791_v17, %v806_v4  ;;  %v891_v18 = vsub.s32 7, %v2823_v49 }
 0x221   :  { %v824_v19 = vrot.slane %v2791_v17, %v823_v7  ;;  %v841_v28 = vrot.slane %v2791_v17, %v840_v1  ;;  %v858_v35 = vrot.slane %v2791_v17, %v857_v15 }
 0x222   :  { %v661_v37 = vadd.f32 %v660_v34, %v656_v29  ;;  %v875_v29 = vrot.slane %v2791_v17, %v874_v11  ;;  %v892_v40 = vrot.slane %v2791_v17, %v891_v18 }
 0x224   :  { %v666_v41 = vadd.f32 %v665_v38, %v661_v37 }
 0x226   :  { %v671_v46 = vadd.f32 %v670_v43, %v666_v41 }
 0x228   :  { %v676_v55 = vadd.f32 %v675_v52, %v671_v46 }
 0x22a   :  { %v681_v2 = vadd.f32 %v680_v61, %v676_v55  ;;  %v2023_v55 = vld [vmem:[%s3204_s9 + $0x2] ss:$0 sm:$0xff] }
 0x22c   :  { %v686_v9 = vadd.f32 %v685_v5, %v681_v2 }
 0x251   :  { %v398_v22 = vpop.f32.mrb[0].mxu1  ;;  %v2800_v23 = vpop.f32.mrb[2].mxu0 }
 0x252   :  { %v400_v24 = vpop.f32.mrb[1].mxu1  ;;  %v2802_v25 = vpop.f32.mrb[3].mxu0  ;;  %v774_v10 = vadd.f32 %v773_v3, %v398_v22  ;;  %v690_v22 = vrot.slane %v686_v9, %v2836_v58  ;;  %v808_v27 = vadd.f32 %v807_v13, %v2800_v23  ;;  %v766_v23 = vld [vmem:[%s3228_s3] sm:$0xff] }
 0x253   :  { %v791_v16 = vadd.f32 %v790_v6, %v400_v24  ;;  %v767_v24 = vld [vmem:[%s3228_s3 + $0x8] sm:$0xff]  ;;  %v825_v39 = vadd.f32 %v824_v19, %v2802_v25 }
 0x254   :  { %v777_v26 = vmax.f32 %v774_v10, 0.0  ;;  %v811_v52 = vmax.f32 %v808_v27, 0.0 }
 0x255   :  { %v404_v30 = vpop.f32.mrb[2].mxu1  ;;  %v481_v31 = vpop.f32.mrb[4].mxu0  ;;  %v794_v38 = vmax.f32 %v791_v16, 0.0  ;;  %v828_v2 = vmax.f32 %v825_v39, 0.0 }
 0x256   :  { %v406_v32 = vpop.f32.mrb[3].mxu1  ;;  %v483_v33 = vpop.f32.mrb[5].mxu0  ;;  %v775_v8 = vadd.f32 %v773_v3, %v404_v30  ;;  %v809_v21 = vadd.f32 %v807_v13, %v481_v31  ;;  %v817_v10 = vmul.f32 %v2023_v55, %v811_v52 }
 0x257   :  { %v792_v14 = vadd.f32 %v790_v6, %v406_v32  ;;  %v2021_v32 = vld [vmem:[%s3204_s9] ss:$0 sm:$0xff]  ;;  %v826_v31 = vadd.f32 %v824_v19, %v483_v33  ;;  %v800_v63 = vmul.f32 %v2022_v42, %v794_v38 }
 0x258   :  { %v778_v20 = vmax.f32 %v775_v8, 0.0  ;;  %v812_v33 = vmax.f32 %v809_v21, 0.0  ;;  %v783_v46 = vmul.f32 %v2021_v32, %v777_v26  ;;  %v2026_v21 = vld [vmem:[%s3204_s9 + $0x5] ss:$0 sm:$0xff] }
 0x259   :  { %v795_v34 = vmax.f32 %v792_v14, 0.0  ;;  %v829_v61 = vmax.f32 %v826_v31, 0.0 }
 0x25a   :  { %v784_v43 = vmul.f32 %v2021_v32, %v778_v20  ;;  %v818_v6 = vmul.f32 %v2023_v55, %v812_v33 }
 0x25b   :  { %v801_v25 = vmul.f32 %v2022_v42, %v795_v34 }
 0x261   :  { %v552_v47 = vpop.f32.mrb[4].mxu1  ;;  %v2821_v48 = vpop.f32.mrb[6].mxu0 }
 0x262   :  { %v2825_v50 = vpop.f32.mrb[5].mxu1  ;;  %v2827_v51 = vpop.f32.mrb[7].mxu0  ;;  %v842_v53 = vadd.f32 %v841_v28, %v552_v47  ;;  %v876_v11 = vadd.f32 %v875_v29, %v2821_v48 }
 0x263   :  { %v859_v3 = vadd.f32 %v858_v35, %v2825_v50  ;;  %v2025_v50 = vld [vmem:[%s3204_s9 + $0x4] ss:$0 sm:$0xff]  ;;  %v893_v20 = vadd.f32 %v892_v40, %v2827_v51 }
 0x264   :  { %v845_v1 = vmax.f32 %v842_v53, 0.0 }
 0x265   :  { %v558_v56 = vpop.f32.mrb[6].mxu1  ;;  %v2833_v57 = vpop.f32.mrb[8].mxu0  ;;  %v862_v19 = vmax.f32 %v859_v3, 0.0  ;;  %v896_v51 = vmax.f32 %v893_v20, 0.0 }
 0x266   :  { %v560_v59 = vpop.f32.mrb[7].mxu1  ;;  %v2838_v60 = vpop.f32.mrb[9].mxu0  ;;  %v843_v44 = vadd.f32 %v841_v28, %v558_v56  ;;  %v2024_v56 = vld [vmem:[%s3204_s9 + $0x3] ss:$0 sm:$0xff]  ;;  %v877_v8 = vadd.f32 %v875_v29, %v2833_v57  ;;  %v851_v27 = vmul.f32 %v2025_v50, %v845_v1  ;;  %v879_v28 = vmax.f32 %v876_v11, 0.0  ;;  %v1167_v1 = vld [vmem:[%s3207_s12 + $0x8] sm:$0xff] }
 0x267   :  { %v860_v17 = vadd.f32 %v858_v35, %v560_v59  ;;  %v835_v13 = vmul.f32 %v2024_v56, %v829_v61  ;;  %v894_v15 = vadd.f32 %v892_v40, %v2838_v60  ;;  %v834_v18 = vmul.f32 %v2024_v56, %v828_v2  ;;  %v2027_v60 = vld [vmem:[%s3204_s9 + $0x6] ss:$0 sm:$0xff]  ;;  %v2028_v35 = vld [vmem:[%s3204_s9 + $0x7] ss:$0 sm:$0xff]  ;;  %v1168_v11 = vld [vmem:[%s3207_s12 + $0x10] sm:$0xff] }
 0x268   :  { %v846_v47 = vmax.f32 %v843_v44, 0.0  ;;  %v868_v34 = vmul.f32 %v2026_v21, %v862_v19 }
 0x269   :  { %v863_v14 = vmax.f32 %v860_v17, 0.0 }
 0x26a   :  { %v852_v48 = vmul.f32 %v2025_v50, %v846_v47  ;;  %v1071_v47 = vld [vmem:[%s3206_s11] sm:$0xff] }
 0x271   :  { %v2179_v30 = vpop.f32.mrb[8].mxu1 }
 0x272   :  { %v763_v36 = vadd.f32 %v2179_v30, %v690_v22  ;;  %v757_v37 = vpop.f32.mrb[9].mxu1  ;;  %v869_v30 = vmul.f32 %v2026_v21, %v863_v14 }
 0x273   :  { %v758_v41 = vadd.f32 %v757_v37, %v690_v22  ;;  %v880_v22 = vmax.f32 %v877_v8, 0.0  ;;  %v1072_v8 = vld [vmem:[%s3206_s11 + $0x8] sm:$0xff] }
 0x274   :  { %v769_v45 = vadd.f32 %v767_v24, %v763_v36  ;;  %v897_v24 = vmax.f32 %v894_v15, 0.0 }
 0x275   :  { %v768_v54 = vadd.f32 %v766_v23, %v758_v41  ;;  %v886_v36 = vmul.f32 %v2027_v60, %v880_v22  ;;  %v885_v23 = vmul.f32 %v2027_v60, %v879_v28  ;;  %v902_v41 = vmul.f32 %v2028_v35, %v896_v51 }
 0x276   :  { %v786_v62 = vadd.f32 %v784_v43, %v769_v45  ;;  %v903_v39 = vmul.f32 %v2028_v35, %v897_v24  ;;  %v1073_v35 = vld [vmem:[%s3206_s11 + $0x10] sm:$0xff] }
 0x277   :  { %v785_v5 = vadd.f32 %v783_v46, %v768_v54 }
 0x278   :  { %v803_v9 = vadd.f32 %v801_v25, %v786_v62 }
 0x279   :  { %v802_v59 = vadd.f32 %v800_v63, %v785_v5 }
 0x27a   :  { %v820_v16 = vadd.f32 %v818_v6, %v803_v9  ;;  %v982_v6 = vld [vmem:[%s3205_s10] sm:$0xff]  ;;  %v2403_v9 = vpack.c.bf16 %v1072_v8, %v1071_v47  ;;  %s3161_s10 = sld [smem:[#allocation5 + $0x2]] }
 0x27b   :  { %v819_v57 = vadd.f32 %v817_v10, %v802_v59  ;;  %2180 = vmatprep.subr.mxu0 %v982_v6  ;;  %v1166_v10 = vld [vmem:[%s3207_s12] sm:$0xff]  ;;  %v1169_v59 = vld [vmem:[%s3207_s12 + $0x18] sm:$0xff] }
 0x27c   :  { %v837_v26 = vadd.f32 %v835_v13, %v820_v16  ;;  %2181 = vmatpush3.msra.mxu0 %v982_v6  ;;  %2224 = vmatprep.mubr.msk.f32.mxu1 %vm103_vm0, %v1166_v10  ;;  %v1173_v6 = vld [vmem:[%s3207_s12 + $0x38] sm:$0xff]  ;;  %v1174_v47 = vld [vmem:[%s3207_s12 + $0x40] sm:$0xff] }
 0x27d   :  { %v836_v29 = vadd.f32 %v834_v18, %v819_v57  ;;  %2404 = vmatprep.subr.bf16.mxu0 %v2403_v9  ;;  %2225 = vmatmul.mubr.msk.f32.vlgmr.msra.gmra.mrb[10].mxu1 %vm103_vm0, %v1167_v1  ;;  %v1083_v8 = vld [vmem:[%s3206_s11 + $0x60] sm:$0xff]  ;;  %v1085_v1 = vld [vmem:[%s3206_s11 + $0x70] sm:$0xff] }
 0x27e   :  { %v854_v32 = vadd.f32 %v852_v48, %v837_v26  ;;  %2227 = vmatprep.mubr.msk.f32.mxu1 %vm103_vm0, %v1168_v11  ;;  %v1086_v11 = vld [vmem:[%s3206_s11 + $0x78] sm:$0xff] }
 0x27f   :  { %v853_v31 = vadd.f32 %v851_v27, %v836_v29 }
 0x280   :  { %v871_v37 = vadd.f32 %v869_v30, %v854_v32 }
 0x281   :  { %v870_v38 = vadd.f32 %v868_v34, %v853_v31  ;;  %2228 = vmatmul.mubr.msk.f32.gmra.mrb[12].mxu1 %vm103_vm0, %v1169_v59  ;;  %v1175_v59 = vld [vmem:[%s3207_s12 + $0x48] sm:$0xff] }
 0x282   :  { %v888_v40 = vadd.f32 %v886_v36, %v871_v37  ;;  %v1074_v36 = vld [vmem:[%s3206_s11 + $0x18] sm:$0xff] }
 0x283   :  { %v887_v42 = vadd.f32 %v885_v23, %v870_v38 }
 0x284   :  { %v2904_v43 = vadd.f32 %v903_v39, %v888_v40 }
 0x285   :  { %v2906_v33 = vadd.f32 %v902_v41, %v887_v42  ;;  %v2407_v42 = vpack.c.bf16 %v1074_v36, %v1073_v35 }
 0x286   :  { %v944_v44 = vsel %vm940_vm7, %v2904_v43, -inf  ;;  %v909_v45 = vsel %vm103_vm0, %v2904_v43, -inf  ;;  %v916_v46 = vsel %vm912_vm8, %v2904_v43, -inf  ;;  %v923_v53 = vsel %vm919_vm9, %v2904_v43, -inf }
 0x287   :  { %945 = vmax.xlane.f32.xlu1 %v944_v44  ;;  %910 = vmax.xlane.f32.xlu0 %v909_v45  ;;  %v913_v52 = vsel %vm912_vm8, %v2906_v33, -inf  ;;  %v951_v54 = vsel %vm947_vm10, %v2904_v43, -inf  ;;  %v930_v55 = vsel %vm926_vm11, %v2904_v43, -inf  ;;  %v958_v25 = vsel %vm954_vm12, %v2904_v43, -inf  ;;  %v1075_v45 = vld [vmem:[%s3206_s11 + $0x20] sm:$0xff] }
 0x288   :  { %v937_v61 = vsel %vm933_vm13, %v2904_v43, -inf  ;;  %v906_v17 = vsel %vm103_vm0, %v2906_v33, -inf  ;;  %v920_v62 = vsel %vm919_vm9, %v2906_v33, -inf  ;;  %v927_v63 = vsel %vm926_vm11, %v2906_v33, -inf }
 0x289   :  { %v934_v2 = vsel %vm933_vm13, %v2906_v33, -inf  ;;  %v941_v3 = vsel %vm940_vm7, %v2906_v33, -inf  ;;  %v948_v5 = vsel %vm947_vm10, %v2906_v33, -inf  ;;  %v955_v56 = vsel %vm954_vm12, %v2906_v33, -inf }
 0x28a   :  { %vm983_vm7 = vcmask 64512   ;;  %vm1632_vm10 = vcmask 1043456  }
 0x28b   :  { %917 = vmax.xlane.f32.xlu0 %v916_v46  ;;  %914 = vmax.xlane.f32.xlu1 %v913_v52  ;;  %v1076_v46 = vld [vmem:[%s3206_s11 + $0x28] sm:$0xff] }
 0x28c   :  { %v2411_v52 = vpack.c.bf16 %v1076_v46, %v1075_v45  ;;  %v1382_v45 = vld [vmem:[%s3208_s13 + $0x38] sm:$0xff]  ;;  %v1381_v46 = vld [vmem:[%s3208_s13 + $0x30] sm:$0xff] }
 0x28f   :  { %924 = vmax.xlane.f32.xlu0 %v923_v53  ;;  %952 = vmax.xlane.f32.xlu1 %v951_v54  ;;  %v1077_v53 = vld [vmem:[%s3206_s11 + $0x30] sm:$0xff]  ;;  %v1078_v54 = vld [vmem:[%s3206_s11 + $0x38] sm:$0xff] }
 0x293   :  { %931 = vmax.xlane.f32.xlu0 %v930_v55  ;;  %959 = vmax.xlane.f32.xlu1 %v958_v25  ;;  %v2415_v55 = vpack.c.bf16 %v1078_v54, %v1077_v53  ;;  %v1079_v25 = vld [vmem:[%s3206_s11 + $0x40] sm:$0xff] }
 0x297   :  { %938 = vmax.xlane.f32.xlu0 %v937_v61  ;;  %v1080_v61 = vld [vmem:[%s3206_s11 + $0x48] sm:$0xff] }
 0x29b   :  { %907 = vmax.xlane.f32.xlu0 %v906_v17  ;;  %v1170_v17 = vld [vmem:[%s3207_s12 + $0x20] sm:$0xff] }
 0x29c   :  { %2230 = vmatprep.mubr.msk.f32.mxu1 %vm103_vm0, %v1170_v17  ;;  %v1383_v17 = vld [vmem:[%s3208_s13 + $0x40] sm:$0xff] }
 0x29f   :  { %921 = vmax.xlane.f32.xlu0 %v920_v62  ;;  %v2419_v62 = vpack.c.bf16 %v1080_v61, %v1079_v25  ;;  %v1384_v61 = vld [vmem:[%s3208_s13 + $0x48] sm:$0xff] }
 0x2a3   :  { %928 = vmax.xlane.f32.xlu0 %v927_v63  ;;  %v1171_v63 = vld [vmem:[%s3207_s12 + $0x28] sm:$0xff] }
 0x2a4   :  { %2231 = vmatmul.mubr.msk.f32.gmra.mrb[14].mxu1 %vm103_vm0, %v1171_v63 }
 0x2a7   :  { %935 = vmax.xlane.f32.xlu0 %v934_v2  ;;  %v1081_v2 = vld [vmem:[%s3206_s11 + $0x50] sm:$0xff] }
 0x2ab   :  { %942 = vmax.xlane.f32.xlu0 %v941_v3  ;;  %v1082_v3 = vld [vmem:[%s3206_s11 + $0x58] sm:$0xff] }
 0x2af   :  { %949 = vmax.xlane.f32.xlu0 %v948_v5  ;;  %v1172_v5 = vld [vmem:[%s3207_s12 + $0x30] sm:$0xff] }
 0x2b0   :  { %2233 = vmatprep.mubr.msk.f32.mxu1 %vm103_vm0, %v1172_v5 }
 0x2b1   :  { %2234 = vmatmul.mubr.msk.f32.gmra.mrb[16].mxu1 %vm103_vm0, %v1173_v6  ;;  %v1385_v6 = vld [vmem:[%s3208_s13 + $0x50] sm:$0xff] }
 0x2b2   :  { %2236 = vmatprep.mubr.msk.f32.mxu1 %vm103_vm0, %v1174_v47 }
 0x2b3   :  { %956 = vmax.xlane.f32.xlu0 %v955_v56  ;;  %v2423_v56 = vpack.c.bf16 %v1082_v3, %v1081_v2 }
 0x2b5   :  { %2237 = vmatmul.mubr.msk.f32.gmra.mrb[18].mxu1 %vm103_vm0, %v1175_v59 }
 0x314   :  { %v911_v13 = vpop.xlane.xlu0 %910  ;;  %v946_v20 = vpop.xlane.xlu1 %945 }
 0x318   :  { %v918_v50 = vpop.xlane.xlu0 %917  ;;  %v915_v48 = vpop.xlane.xlu1 %914 }
 0x319   :  { %v963_v22 = vsel %vm961_vm14, %v911_v13, %v918_v50  ;;  %v1176_v13 = vld [vmem:[%s3207_s12 + $0x50] sm:$0xff]  ;;  %v2431_v50 = vpack.c.bf16 %v1086_v11, %v1085_v1 }
 0x31a   :  { %2239 = vmatprep.mubr.msk.f32.mxu1 %vm103_vm0, %v1176_v13  ;;  %v1388_v13 = vld [vmem:[%s3208_s13 + $0x68] sm:$0xff] }
 0x31c   :  { %v925_v14 = vpop.xlane.xlu0 %924  ;;  %v953_v60 = vpop.xlane.xlu1 %952 }
 0x31d   :  { %v966_v26 = vsel %vm964_vm15, %v963_v22, %v925_v14  ;;  %v1177_v14 = vld [vmem:[%s3207_s12 + $0x58] sm:$0xff] }
 0x31e   :  { %2240 = vmatmul.mubr.msk.f32.gmra.mrb[20].mxu1 %vm103_vm0, %v1177_v14  ;;  %v1387_v14 = vld [vmem:[%s3208_s13 + $0x60] sm:$0xff] }
 0x320   :  { %v932_v15 = vpop.xlane.xlu0 %931  ;;  %v960_v40 = vpop.xlane.xlu1 %959 }
 0x321   :  { %v969_v27 = vsel %vm967_vm2, %v966_v26, %v932_v15  ;;  %v1178_v15 = vld [vmem:[%s3207_s12 + $0x60] sm:$0xff] }
 0x322   :  { %2242 = vmatprep.mubr.msk.f32.mxu1 %vm103_vm0, %v1178_v15 }
 0x324   :  { %v939_v16 = vpop.xlane.xlu0 %938 }
 0x325   :  { %v972_v29 = vsel %vm970_vm3, %v969_v27, %v939_v16  ;;  %v1179_v16 = vld [vmem:[%s3207_s12 + $0x68] sm:$0xff] }
 0x326   :  { %v975_v24 = vsel %vm973_vm4, %v972_v29, %v946_v20  ;;  %v1376_v20 = vld [vmem:[%s3208_s13 + $0x8] sm:$0xff]  ;;  %2243 = vmatmul.mubr.msk.f32.gmra.mrb[22].mxu1 %vm103_vm0, %v1179_v16  ;;  %v1181_v29 = vld [vmem:[%s3207_s12 + $0x78] sm:$0xff] }
 0x327   :  { %v978_v23 = vsel %vm976_vm5, %v975_v24, %v953_v60 }
 0x328   :  { %v908_v18 = vpop.xlane.xlu0 %907  ;;  %v981_v44 = vsel %vm979_vm6, %v978_v23, %v960_v40  ;;  %v1380_v40 = vld [vmem:[%s3208_s13 + $0x28] sm:$0xff] }
 0x329   :  { %v962_v30 = vsel %vm961_vm14, %v908_v18, %v915_v48  ;;  %v1180_v18 = vld [vmem:[%s3207_s12 + $0x70] sm:$0xff]  ;;  %v1378_v48 = vld [vmem:[%s3208_s13 + $0x18] sm:$0xff]  ;;  %s3165_s12 = sld [smem:[#allocation5 + $0x3]] }
 0x32a   :  { %2245 = vmatprep.mubr.msk.f32.mxu1 %vm103_vm0, %v1180_v18 }
 0x32b   :  { %2246 = vmatmul.mubr.msk.f32.gmra.mrb[24].mxu1 %vm103_vm0, %v1181_v29 }
 0x32c   :  { %v922_v19 = vpop.xlane.xlu0 %921 }
 0x32d   :  { %v965_v32 = vsel %vm964_vm15, %v962_v30, %v922_v19 }
 0x330   :  { %v929_v57 = vpop.xlane.xlu0 %928 }
 0x331   :  { %v968_v51 = vsel %vm967_vm2, %v965_v32, %v929_v57 }
 0x334   :  { %v936_v21 = vpop.xlane.xlu0 %935 }
 0x335   :  { %v971_v31 = vsel %vm970_vm3, %v968_v51, %v936_v21  ;;  %v1375_v21 = vld [vmem:[%s3208_s13] sm:$0xff] }
 0x338   :  { %v943_v28 = vpop.xlane.xlu0 %942 }
 0x339   :  { %v974_v37 = vsel %vm973_vm4, %v971_v31, %v943_v28  ;;  %v1377_v28 = vld [vmem:[%s3208_s13 + $0x10] sm:$0xff] }
 0x33c   :  { %v950_v34 = vpop.xlane.xlu0 %949 }
 0x33d   :  { %v977_v38 = vsel %vm976_vm5, %v974_v37, %v950_v34 }
 0x340   :  { %v957_v39 = vpop.xlane.xlu0 %956 }
 0x341   :  { %v980_v41 = vsel %vm979_vm6, %v977_v38, %v957_v39 }
 0x342   :  { %2182 = vmatprep.mubr.msk.f32.mxu0 %vm983_vm7, %v980_v41 }
 0x343   :  { %2183 = vmatmul.mubr.msk.f32.vlgmr.msra.gmra.mrb[10].mxu0 %vm983_vm7, %v981_v44 }
 0x344   :  { %2406 = vmatpush3.bf16.msra.mxu0 %v2403_v9  ;;  %v1084_v9 = vld [vmem:[%s3206_s11 + $0x68] sm:$0xff] }
 0x345   :  { %2408 = vmatprep.subr.bf16.mxu0 %v2407_v42  ;;  %v2427_v10 = vpack.c.bf16 %v1084_v9, %v1083_v8 }
 0x348   :  { %2410 = vmatpush3.bf16.msra.mxu0 %v2407_v42 }
 0x349   :  { %2412 = vmatprep.subr.bf16.mxu0 %v2411_v52 }
 0x34c   :  { %2414 = vmatpush3.bf16.msra.mxu0 %v2411_v52 }
 0x34d   :  { %2416 = vmatprep.subr.bf16.mxu0 %v2415_v55 }
 0x350   :  { %2418 = vmatpush3.bf16.msra.mxu0 %v2415_v55  ;;  %v2226_v19 = vpop.f32.mrb[10].mxu1 }
 0x351   :  { %2420 = vmatprep.subr.bf16.mxu0 %v2419_v62  ;;  %v1296_v57 = vpop.f32.mrb[11].mxu1  ;;  %v1392_v22 = vmul.f32 %v2226_v19, %v1376_v20  ;;  %v1390_v20 = vld [vmem:[%s3208_s13 + $0x78] sm:$0xff] }
 0x352   :  { %v1391_v26 = vmul.f32 %v1375_v21, %v1296_v57  ;;  %v1389_v21 = vld [vmem:[%s3208_s13 + $0x70] sm:$0xff] }
 0x354   :  { %2422 = vmatpush3.bf16.msra.mxu0 %v2419_v62  ;;  %v2229_v27 = vpop.f32.mrb[12].mxu1  ;;  %v2439_v24 = vpack.c.bf16 %v1392_v22, %v1391_v26 }
 0x355   :  { %2424 = vmatprep.subr.bf16.mxu0 %v2423_v56  ;;  %v1394_v60 = vmul.f32 %v2229_v27, %v1378_v48  ;;  %v1306_v30 = vpop.f32.mrb[13].mxu1 }
 0x356   :  { %v1393_v32 = vmul.f32 %v1377_v28, %v1306_v30  ;;  %2440 = vmatprep.subr.bf16.mxu1 %v2439_v24 }
 0x357   :  { %2442 = vmatpush3.bf16.msra.mxu1 %v2439_v24 }
 0x358   :  { %2426 = vmatpush3.bf16.msra.mxu0 %v2423_v56  ;;  %v2443_v34 = vpack.c.bf16 %v1394_v60, %v1393_v32  ;;  %v1386_v56 = vld [vmem:[%s3208_s13 + $0x58] sm:$0xff]  ;;  %v1499_v32 = vld [vmem:[%s3209_s14] sm:$0xff] }
 0x359   :  { %2428 = vmatprep.subr.bf16.mxu0 %v2427_v10 }
 0x35a   :  { %2444 = vmatprep.subr.bf16.mxu1 %v2443_v34 }
 0x35b   :  { %2446 = vmatpush3.bf16.msra.mxu1 %v2443_v34  ;;  %v1500_v34 = vld [vmem:[%s3209_s14 + $0x8] sm:$0xff] }
 0x35c   :  { %2430 = vmatpush3.bf16.msra.mxu0 %v2427_v10 }
 0x35d   :  { %2432 = vmatprep.subr.bf16.mxu0 %v2431_v50 }
 0x360   :  { %2434 = vmatpush3.bf16.msra.mxu0 %v2431_v50 }
 0x416   :  { %v2184_v51 = vpop.f32.mrb[10].mxu0 }
 0x417   :  { %v1066_v31 = vsub.f32 %v2904_v43, %v2184_v51  ;;  %v1056_v35 = vpop.f32.mrb[11].mxu0  ;;  %v1379_v43 = vld [vmem:[%s3208_s13 + $0x20] sm:$0xff]  ;;  %v2471_v51 = vpack.c.bf16 %v1500_v34, %v1499_v32  ;;  %v1799_v32 = vld [vmem:[%s3229_s29 + $0x8] sm:$0xff] }
 0x418   :  { %v1065_v36 = vsub.f32 %v2906_v33, %v1056_v35  ;;  %v2232_v33 = vpop.f32.mrb[14].mxu1  ;;  %v1502_v35 = vld [vmem:[%s3209_s14 + $0x18] sm:$0xff] }
 0x419   :  { %v1069_v37 = vmul.f32 1.442695, %v1066_v31  ;;  %v1396_v41 = vmul.f32 %v2232_v33, %v1380_v40  ;;  %v1316_v42 = vpop.f32.mrb[15].mxu1  ;;  %2472 = vmatprep.subr.bf16.mxu0 %v2471_v51  ;;  %v1501_v31 = vld [vmem:[%s3209_s14 + $0x10] sm:$0xff]  ;;  %v1506_v40 = vld [vmem:[%s3209_s14 + $0x38] sm:$0xff] }
 0x41a   :  { %v1067_v23 = vmul.f32 1.442695, %v1065_v36  ;;  %v1395_v44 = vmul.f32 %v1379_v43, %v1316_v42  ;;  %v2235_v53 = vpop.f32.mrb[16].mxu1  ;;  %v2475_v36 = vpack.c.bf16 %v1502_v35, %v1501_v31  ;;  %v2047_v33 = vld [vmem:[%s3200_s5] ss:$0 sm:$0xff] }
 0x41b   :  { %v1398_v54 = vmul.f32 %v2235_v53, %v1382_v45  ;;  %v1326_v55 = vpop.f32.mrb[17].mxu1 }
 0x41c   :  { %2513 = vpow2.f32 %v1067_v23  ;;  %v2447_v52 = vpack.c.bf16 %v1396_v41, %v1395_v44  ;;  %v1397_v25 = vmul.f32 %v1381_v46, %v1326_v55  ;;  %v2238_v63 = vpop.f32.mrb[18].mxu1  ;;  %v1504_v23 = vld [vmem:[%s3209_s14 + $0x28] sm:$0xff] }
 0x41d   :  { %2515 = vpow2.f32 %v1069_v37  ;;  %v1400_v2 = vmul.f32 %v2238_v63, %v1384_v61  ;;  %v1336_v3 = vpop.f32.mrb[19].mxu1  ;;  %v1503_v37 = vld [vmem:[%s3209_s14 + $0x20] sm:$0xff] }
 0x41e   :  { %2448 = vmatprep.subr.bf16.mxu1 %v2447_v52  ;;  %v2451_v62 = vpack.c.bf16 %v1398_v54, %v1397_v25  ;;  %v1399_v5 = vmul.f32 %v1383_v17, %v1336_v3  ;;  %v2241_v8 = vpop.f32.mrb[20].mxu1  ;;  %v2050_v63 = vld [vmem:[%s3210_s15] ss:$0 sm:$0xff] }
 0x41f   :  { %2450 = vmatpush3.bf16.msra.mxu1 %v2447_v52  ;;  %v1402_v9 = vmul.f32 %v2241_v8, %v1386_v56  ;;  %v1346_v10 = vpop.f32.mrb[21].mxu1  ;;  %v2585_v8 = vmov 6  }
 0x420   :  { %2452 = vmatprep.subr.bf16.mxu1 %v2451_v62  ;;  %v2455_v47 = vpack.c.bf16 %v1400_v2, %v1399_v5  ;;  %v1401_v1 = vmul.f32 %v1385_v6, %v1346_v10  ;;  %v2244_v59 = vpop.f32.mrb[22].mxu1 }
 0x421   :  { %v1356_v50 = vpop.f32.mrb[23].mxu1  ;;  %v1404_v15 = vmul.f32 %v2244_v59, %v1388_v13 }
 0x422   :  { %v2459_v11 = vpack.c.bf16 %v1402_v9, %v1401_v1  ;;  %v1403_v16 = vmul.f32 %v1387_v14, %v1356_v50  ;;  %v2247_v19 = vpop.f32.mrb[24].mxu1  ;;  %v2586_v9 = vmov 7   ;;  %v1628_v1 = vld [vmem:[%s3213_s18] sm:$0x1]  ;;  %s3153_s18 = sld [smem:[#allocation5]] }
 0x423   :  { %2454 = vmatpush3.bf16.msra.mxu1 %v2451_v62  ;;  %v1366_v57 = vpop.f32.mrb[25].mxu1  ;;  %v1406_v48 = vmul.f32 %v2247_v19, %v1390_v20  ;;  %v2582_v62 = vmov 4  }
 0x424   :  { %2456 = vmatprep.subr.bf16.mxu1 %v2455_v47  ;;  %v2463_v18 = vpack.c.bf16 %v1404_v15, %v1403_v16  ;;  %v1405_v22 = vmul.f32 %v1389_v21, %v1366_v57  ;;  %2508 = vset.pattern.permute.xlu0 %v2582_v62 }
 0x426   :  { %v3065_v38 = vpop.eup %2513  ;;  %v2467_v26 = vpack.c.bf16 %v1406_v48, %v1405_v22 }
 0x427   :  { %v3067_v39 = vpop.eup %2515  ;;  %2217 = vmatprep.mubr.f32.mxu0 %v3065_v38  ;;  %2458 = vmatpush3.bf16.msra.mxu1 %v2455_v47  ;;  %v2584_v47 = vmov 5  }
 0x428   :  { %2218 = vmatmul.mubr.f32.vlgmr.msra.gmra.mrb[12].mxu0 %v3067_v39  ;;  %2460 = vmatprep.subr.bf16.mxu1 %v2459_v11  ;;  %v1819_v34 = vstv %s3153_s18 }
 0x429   :  { %2474 = vmatpush3.bf16.msra.mxu0 %v2471_v51 }
 0x42a   :  { %2476 = vmatprep.subr.bf16.mxu0 %v2475_v36 }
 0x42b   :  { %2462 = vmatpush3.bf16.msra.mxu1 %v2459_v11  ;;  %v1627_v11 = vld [vmem:[%s3212_s17] sm:$0xf]  ;;  %s3157_s17 = sld [smem:[#allocation5 + $0x1]] }
 0x42c   :  { %2464 = vmatprep.subr.bf16.mxu1 %v2463_v18 }
 0x42d   :  { %2478 = vmatpush3.bf16.msra.mxu0 %v2475_v36 }
 0x42f   :  { %2466 = vmatpush3.bf16.msra.mxu1 %v2463_v18 }
 0x430   :  { %2468 = vmatprep.subr.bf16.mxu1 %v2467_v26 }
 0x433   :  { %2470 = vmatpush3.bf16.msra.mxu1 %v2467_v26 }
 0x434   :  { %2302 = vmatprep.subr.mxu1 %v2575_v12 }
 0x4fb   :  { %v2219_v27 = vpop.f32.mrb[12].mxu0 }
 0x4fc   :  { %2517 = vrcp.f32 %v2219_v27  ;;  %v1153_v28 = vpop.f32.mrb[13].mxu0 }
 0x4fd   :  { %2519 = vrcp.f32 %v1153_v28 }
 0x506   :  { %v2518_v29 = vpop.eup %2517 }
 0x507   :  { %v2520_v60 = vpop.eup %2519  ;;  %v1165_v24 = vmul.f32 %v2518_v29, %v3067_v39  ;;  %v1505_v39 = vld [vmem:[%s3209_s14 + $0x30] sm:$0xff] }
 0x508   :  { %v1163_v30 = vmul.f32 %v2520_v60, %v3065_v38  ;;  %v2479_v38 = vpack.c.bf16 %v1504_v23, %v1503_v37  ;;  %v2483_v43 = vpack.c.bf16 %v1506_v40, %v1505_v39  ;;  %v1841_v39 = vstv %s3157_s17 }
 0x50a   :  { %2280 = vmatprep.mubr.f32.mxu1 %v1163_v30  ;;  %2480 = vmatprep.subr.bf16.mxu0 %v2479_v38 }
 0x50b   :  { %2281 = vmatmul.mubr.f32.vlgmr.msra.gmra.mrb[26].mxu1 %v1165_v24  ;;  %2482 = vmatpush3.bf16.msra.mxu0 %v2479_v38 }
 0x50c   :  { %2484 = vmatprep.subr.bf16.mxu0 %v2483_v43 }
 0x50f   :  { %2486 = vmatpush3.bf16.msra.mxu0 %v2483_v43 }
 0x5de   :  { %v2282_v41 = vpop.f32.mrb[26].mxu1 }
 0x5df   :  { %v1486_v42 = vadd.f32 %v2282_v41, %v2047_v33  ;;  %v1480_v44 = vpop.f32.mrb[27].mxu1 }
 0x5e0   :  { %v1481_v45 = vadd.f32 %v2047_v33, %v1480_v44 }
 0x5e1   :  { %v1493_v46 = vmul.f32 1.442695, %v1486_v42  ;;  %vm1490_vm9 = vcmp.gt.f32.partialorder %v1486_v42, 0.0 }
 0x5e2   :  { %v1491_v52 = vmul.f32 1.442695, %v1481_v45  ;;  %vm1489_vm8 = vcmp.gt.f32.partialorder %v1481_v45, 0.0 }
 0x5e3   :  { %2521 = vpow2.f32 %v1493_v46 }
 0x5e4   :  { %2523 = vpow2.f32 %v1491_v52 }
 0x5ed   :  { %v2522_v53 = vpop.eup %2521 }
 0x5ee   :  { %v2524_v54 = vpop.eup %2523  ;;  %v2049_v55 = vadd.f32 -1.0, %v2522_v53 }
 0x5ef   :  { %v2048_v25 = vadd.f32 -1.0, %v2524_v54 }
 0x5f0   :  { %v1498_v17 = vsel %vm1490_vm9, %v1486_v42, %v2049_v55 }
 0x5f1   :  { %v1497_v61 = vsel %vm1489_vm8, %v1481_v45, %v2048_v25  ;;  %v1863_v45 = vstv %s3161_s10 }
 0x5f2   :  { %2299 = vmatprep.mubr.msk.f32.mxu0 %vm250_vm1, %v1497_v61 }
 0x5f3   :  { %2300 = vmatmul.mubr.msk.f32.vlgmr.msra.gmra.mrb[14].mxu0 %vm250_vm1, %v1498_v17  ;;  %vm2587_vm1 = vmmov 0   ;;  %v1885_v17 = vstv %s3165_s12 }
 0x5f4   :  { %2304 = vmatprep.mubr.msk.f32.mxu1 %vm2587_vm1, %v2575_v12 }
 0x6c6   :  { %v2301_v2 = vpop.f32.mrb[14].mxu0 }
 0x6c7   :  { %v1592_v3 = vadd.f32 %v2301_v2, %v2050_v63  ;;  %v1586_v5 = vpop.f32.mrb[15].mxu0 }
 0x6c8   :  { %v1587_v56 = vadd.f32 %v2050_v63, %v1586_v5 }
 0x6c9   :  { %1714 = vrot.lane.b32.xlu1 %v1592_v3, %s2583_s22 }
 0x6ca   :  { %1712 = vrot.lane.b32.xlu0 %v1587_v56, %s2583_s22  ;;  %v2487_v6 = vpack.c.bf16 %v1592_v3, %v1587_v56 }
 0x6cc   :  { %2488 = vmatprep.subr.bf16.mxu0 %v2487_v6 }
 0x6cd   :  { %2490 = vmatpush3.bf16.msra.mxu0 %v2487_v6 }
 0x6ce   :  { %1803 = vperm.xlu0 %2508, %v1587_v56  }
 0x6d2   :  { %1807 = vperm.xlu0 %2508, %v1592_v3  }
 0x6d6   :  { %2509 = vset.pattern.permute.xlu0 %v2584_v47 }
 0x6d7   :  { %1825 = vperm.xlu0 %2509, %v1587_v56  }
 0x6db   :  { %1829 = vperm.xlu0 %2509, %v1592_v3  }
 0x6df   :  { %2510 = vset.pattern.permute.xlu0 %v2585_v8 }
 0x6e0   :  { %1847 = vperm.xlu0 %2510, %v1587_v56  }
 0x6e4   :  { %1851 = vperm.xlu0 %2510, %v1592_v3  }
 0x6e8   :  { %2511 = vset.pattern.permute.xlu0 %v2586_v9 }
 0x6e9   :  { %1869 = vperm.xlu0 %2511, %v1587_v56  }
 0x6f2   :  { %1595 = vxpose.xlu1.b32.start [1/2] (short) (narrow) %v1587_v56, 8 }
 0x6f6   :  { %1596 = vxpose.xlu1.b32.end [2/2] (short) (narrow) %v1592_v3, 8 }
 0x714   :  { %2512 = vset.pattern.permute.xlu1 %v2586_v9 }
 0x715   :  { %1873 = vperm.xlu1 %2512, %v1592_v3  }
 0x73b   :  { %v1715_v10 = vpop.permute.xlu1 %1714 }
 0x73c   :  { %v1713_v13 = vpop.permute.xlu0 %1712 }
 0x74d   :  { %v1804_v12 = vpop.permute.xlu0 %1803 }
 0x751   :  { %v1808_v50 = vpop.permute.xlu0 %1807 }
 0x756   :  { %v1826_v14 = vpop.permute.xlu0 %1825 }
 0x75a   :  { %v1830_v15 = vpop.permute.xlu0 %1829 }
 0x75f   :  { %v1848_v16 = vpop.permute.xlu0 %1847 }
 0x763   :  { %v1852_v20 = vpop.permute.xlu0 %1851 }
 0x768   :  { %v1870_v35 = vpop.permute.xlu0 %1869 }
 0x772   :  { %v1611_v59 = vpop.trf.xlu1 }
 0x773   :  { %2303 = vmatpush3.msk.msra.mxu1 %vm1632_vm10, %v1611_v59  ;;  %v1813_v18 = vrot.slane %v1611_v59, %v2836_v58  ;;  %v1835_v19 = vrot.slane %v1611_v59, %v789_v0  ;;  %v1857_v57 = vrot.slane %v1611_v59, %v806_v4  ;;  %v1879_v29 = vrot.slane %v1611_v59, %v823_v7 }
 0x774   :  { %2305 = vmatmul.mubr.msk.f32.vlgmr.msra.gmra.mrb[28].mxu1 %vm970_vm3, %v1628_v1  ;;  %2307 = vmatprep.subr.msk.mxu1 %vm1632_vm10, %v1627_v11 }
 0x775   :  { %2309 = vmatprep.mubr.msk.f32.mxu1 %vm970_vm3, %v1713_v13  ;;  %2308 = vmatpush3.msk.msra.mxu1 %vm1632_vm10, %v1627_v11  ;;  %v1815_v21 = vadd.f32 %v1813_v18, %v1808_v50  ;;  %v1814_v22 = vadd.f32 %v1813_v18, %v1804_v12  ;;  %v1837_v26 = vadd.f32 %v1835_v19, %v1830_v15 }
 0x776   :  { %v1836_v28 = vadd.f32 %v1835_v19, %v1826_v14  ;;  %v1859_v4 = vadd.f32 %v1857_v57, %v1852_v20  ;;  %v1858_v31 = vadd.f32 %v1857_v57, %v1848_v16  ;;  %v1880_v23 = vadd.f32 %v1879_v29, %v1870_v35 }
 0x777   :  { %v1818_v30 = vmax.f32 %v1815_v21, 0.0  ;;  %v1817_v51 = vmax.f32 %v1814_v22, 0.0  ;;  %v1840_v37 = vmax.f32 %v1837_v26, 0.0 }
 0x778   :  { %2310 = vmatmul.mubr.msk.f32.vlgmr.msra.gmra.mrb[30].mxu1 %vm970_vm3, %v1715_v10  ;;  %v1839_v40 = vmax.f32 %v1836_v28, 0.0  ;;  %v1862_v41 = vmax.f32 %v1859_v4, 0.0  ;;  %v1861_v46 = vmax.f32 %v1858_v31, 0.0  ;;  %v1883_v55 = vmax.f32 %v1880_v23, 0.0 }
 0x779   :  { %v1821_v33 = vmul.f32 %v1819_v34, %v1818_v30  ;;  %v1820_v44 = vmul.f32 %v1819_v34, %v1817_v51  ;;  %v1843_v54 = vmul.f32 %v1841_v39, %v1840_v37 }
 0x77a   :  { %v1842_v61 = vmul.f32 %v1841_v39, %v1839_v40  ;;  %v1865_v63 = vmul.f32 %v1863_v45, %v1862_v41  ;;  %v1864_v3 = vmul.f32 %v1863_v45, %v1861_v46  ;;  %v1886_v47 = vmul.f32 %v1885_v17, %v1883_v55 }
 0x794   :  { %v1874_v60 = vpop.permute.xlu1 %1873 }
 0x795   :  { %v1881_v49 = vadd.f32 %v1879_v29, %v1874_v60 }
 0x797   :  { %v1884_v52 = vmax.f32 %v1881_v49, 0.0 }
 0x799   :  { %v1887_v5 = vmul.f32 %v1885_v17, %v1884_v52 }
 0x847   :  { %v1702_v48 = vpop.f32.mrb[28].mxu1 }
 0x848   :  { %v2306_v27 = vpop.f32.mrb[29].mxu1  ;;  %v1709_v0 = vrot.slane %v1702_v48, %v2836_v58  ;;  %v1798_v58 = vld [vmem:[%s3229_s29] sm:$0xff] }
 0x849   :  { %v2061_v27 = vld [vmem:[%s3211_s16] ss:$0 sm:$0xff] }
 0x84b   :  { %v2311_v24 = vpop.f32.mrb[30].mxu1 }
 0x84c   :  { %v1795_v7 = vadd.f32 %v2311_v24, %v1709_v0  ;;  %v1789_v36 = vpop.f32.mrb[31].mxu1 }
 0x84d   :  { %v1790_v38 = vadd.f32 %v1789_v36, %v1709_v0 }
 0x84e   :  { %v1801_v43 = vadd.f32 %v1799_v32, %v1795_v7 }
 0x84f   :  { %v1800_v42 = vadd.f32 %v1798_v58, %v1790_v38 }
 0x850   :  { %v1823_v53 = vadd.f32 %v1821_v33, %v1801_v43 }
 0x851   :  { %v1822_v25 = vadd.f32 %v1820_v44, %v1800_v42 }
 0x852   :  { %v1845_v62 = vadd.f32 %v1843_v54, %v1823_v53 }
 0x853   :  { %v1844_v2 = vadd.f32 %v1842_v61, %v1822_v25 }
 0x854   :  { %v1867_v56 = vadd.f32 %v1865_v63, %v1845_v62 }
 0x855   :  { %v1866_v6 = vadd.f32 %v1864_v3, %v1844_v2 }
 0x856   :  { %v1889_v8 = vadd.f32 %v1887_v5, %v1867_v56 }
 0x857   :  { %v1888_v9 = vadd.f32 %v1886_v47, %v1866_v6 }
 0x858   :  { %v1893_v10 = vsel %vm103_vm0, %v1889_v8, -inf }
 0x859   :  { %1894 = vmax.xlane.f32.xlu1 %v1893_v10  ;;  %v1890_v1 = vsel %vm103_vm0, %v1888_v9, -inf }
 0x85a   :  { %1891 = vmax.xlane.f32.xlu0 %v1890_v1 }
 0x8e6   :  { %v1895_v11 = vpop.xlane.xlu1 %1894 }
 0x8e7   :  { %v1897_v59 = vsub.f32 %v1889_v8, %v1895_v11  ;;  %v1892_v13 = vpop.xlane.xlu0 %1891 }
 0x8e8   :  { %v1896_v12 = vsub.f32 %v1888_v9, %v1892_v13 }
 0x8e9   :  { %v1900_v50 = vmul.f32 1.442695, %v1897_v59 }
 0x8ea   :  { %v1898_v14 = vmul.f32 1.442695, %v1896_v12 }
 0x8ec   :  { %2525 = vpow2.f32 %v1898_v14 }
 0x8ed   :  { %2527 = vpow2.f32 %v1900_v50 }
 0x8f6   :  { %v2526_v15 = vpop.eup %2525 }
 0x8f7   :  { %v1902_v16 = vsel %vm103_vm0, %v2526_v15, 0.0  ;;  %v2528_v18 = vpop.eup %2527 }
 0x8f8   :  { %1903 = vadd.xlane.f32.xlu0 %v1902_v16  ;;  %v1905_v19 = vsel %vm103_vm0, %v2528_v18, 0.0 }
 0x8fc   :  { %1906 = vadd.xlane.f32.xlu0 %v1905_v19 }
 0x985   :  { %v1904_v20 = vpop.xlane.xlu0 %1903 }
 0x986   :  { %2529 = vrcp.f32 %v1904_v20 }
 0x989   :  { %v1907_v57 = vpop.xlane.xlu0 %1906 }
 0x98a   :  { %2531 = vrcp.f32 %v1907_v57 }
 0x990   :  { %v2530_v21 = vpop.eup %2529 }
 0x991   :  { %v1909_v48 = vmul.f32 %v2530_v21, %v2526_v15 }
 0x993   :  { %2316 = vmatprep.mubr.msk.f32.mxu0 %vm103_vm0, %v1909_v48 }
 0x994   :  { %v2532_v22 = vpop.eup %2531 }
 0x995   :  { %v1911_v26 = vmul.f32 %v2532_v22, %v2528_v18 }
 0x997   :  { %2317 = vmatmul.mubr.msk.f32.vlgmr.msra.gmra.mrb[16].mxu0 %vm103_vm0, %v1911_v26 }
 0xa6a   :  { %v2318_v28 = vpop.f32.mrb[16].mxu0 }
 0xa6b   :  { %v1997_v29 = vadd.f32 %v2318_v28, %v2061_v27  ;;  %v1991_v60 = vpop.f32.mrb[17].mxu0 }
 0xa6c   :  { %v1992_v0 = vadd.f32 %v2061_v27, %v1991_v60 }
 0xa6d   :  { %2001 = vst.msk [vmem:[%s3215_s20 + $0x8] sm:$0xff] %vm970_vm3, %v1997_v29 }
 0xa6e   :  { %2000 = vst.msk [vmem:[%s3215_s20] sm:$0xff] %vm970_vm3, %v1992_v0 }
 0xa6f   :  { %2006 = vsyncpa [#allocation3], 1 }
 0xa70   :  { %2007 = vsyncpa [#allocation4], 1 }

</bundles_post_ra>
